<compile_context>
chip_gen: v7x
topology: tpu7x:2x2x1
jax: 0.10.0
libtpu: 0.0.40
codegen_flags: <defaults>
</compile_context>

<pallas_src>
import jax
import jax.numpy as jnp
from jax.experimental import pallas as pl
from jax.experimental.pallas import tpu as pltpu

# ---- small, TPU-friendly shapes consistent with the module's forward ----
B = 8            # batch (single tile; raise / tile for real serving batches)
D_VISION = 256   # stand-in for blip.vision_model.config.hidden_size
D_TEXT = 128     # stand-in for dim of text_embeds fed to text_map
D_QFORMER = 128  # stand-in for blip.qformer.config.hidden_size
MAP_DIM = 128    # stand-in for map_dim (=1024 in the original)
NUM_MAP_LAYERS = 5            # 1 input linear + 4 hidden linears (image/text map)
N_HIDDEN = NUM_MAP_LAYERS - 1
D_IN = D_VISION + D_TEXT + D_QFORMER   # 512 fused input width
D_MAP2 = 2 * MAP_DIM                   # 256 fused img|txt width
D_MAP3 = 3 * MAP_DIM                   # 384 concat-head width


def _l2_normalize(x):
    # matches F.normalize(x, p=2, dim=1, eps=1e-12): x / max(||x||, 1e-12)
    ss = jnp.sum(x * x, axis=-1, keepdims=True)
    return x * jax.lax.rsqrt(jnp.maximum(ss, 1e-24))


def blip_head_kernel(x_ref, w0_ref, bvec_ref, wh_hbm, wpre_hbm, out_ref,
                     wh_vmem, wpre_vmem, sem):
    # ---- kick off hidden / pre_output weight DMAs; they overlap compute ----
    # (If the batch grid ever has >1 step, guard start/wait with
    #  pl.when(pl.program_id(0) == 0) since the VMEM scratch persists.)
    wh_copies = [
        pltpu.make_async_copy(wh_hbm.at[i], wh_vmem.at[i], sem.at[i])
        for i in range(N_HIDDEN)
    ]
    wpre_copy = pltpu.make_async_copy(wpre_hbm, wpre_vmem, sem.at[N_HIDDEN])
    for c in wh_copies:
        c.start()
    wpre_copy.start()

    # ---- fused layer 0: block-diag(wi0, wt0, wq), one MXU issue ----
    # x arrives pre-cast to bf16 from the wrapper; biases pre-broadcast [B,384].
    h = jnp.dot(x_ref[...], w0_ref[...],
                preferred_element_type=jnp.float32) + bvec_ref[0]

    it = h[:, 0:D_MAP2]        # fused img|txt stream           [B, 256]
    qf = h[:, D_MAP2:D_MAP3]   # qformer_map has a single Linear [B, 128]

    # ---- 4 fused hidden layers: ReLU -> block-diag(wih[i], wth[i]) ----
    for i in range(N_HIDDEN):
        it = jnp.maximum(it, 0.0)
        wh_copies[i].wait()                                   # layer-i weights ready
        bh = bvec_ref[1 + i]                                  # [B, 384]
        it = jnp.dot(it.astype(jnp.bfloat16), wh_vmem[i],
                     preferred_element_type=jnp.float32) + bh[:, 0:D_MAP2]

    # ---- per-stream L2 normalize (f32, EUP rsqrt) ----
    img_f = _l2_normalize(it[:, 0:MAP_DIM])
    txt_f = _l2_normalize(it[:, MAP_DIM:D_MAP2])
    qf_f = _l2_normalize(qf)

    # ---- pre_output: concat -> Linear(3m, m) -> ReLU ----
    feats = jnp.concatenate([img_f, txt_f, qf_f], axis=-1)    # [B, 384]
    row5 = 1 + N_HIDDEN
    last = bvec_ref[row5]                                     # [B, 384]
    wpre_copy.wait()
    hpre = jnp.dot(feats.astype(jnp.bfloat16), wpre_vmem[...],
                   preferred_element_type=jnp.float32) + last[:, 0:MAP_DIM]
    hpre = jnp.maximum(hpre, 0.0)

    # ---- classifier: Linear(m, 1) as a lane reduction (avoids N=1 MXU) ----
    # last-row layout (fixed by pack_params): [bpre | wcls | bcls@lane0, 0...]
    wcls = last[:, MAP_DIM:D_MAP2]                            # [B, 128]
    bcls_row = last[:, D_MAP2:D_MAP3]                         # bcls at lane 0
    logits = jnp.sum(hpre * wcls + bcls_row, axis=-1, keepdims=True)
    out_ref[...] = jax.nn.sigmoid(logits)


def custom_blip_head(img, txt, qf, packed):
    w0, wh, wpre, bvec = packed
    # bf16 cast in the wrapper: halves x-tile DMA, removes in-kernel cast.
    x = jnp.concatenate([img, txt, qf], axis=-1).astype(jnp.bfloat16)  # [B, 512]

    tb = B  # single batch tile; for B > 8 pick tb (multiple of 8, ideally 128+)
            # so the grid has >=2 steps and v7x's 2nd TensorCore is used.
    return pl.pallas_call(
        blip_head_kernel,
        out_shape=jax.ShapeDtypeStruct((B, 1), jnp.float32),
        grid=(B // tb,),
        in_specs=[
            pl.BlockSpec((tb, D_IN), lambda i: (i, 0)),
            pl.BlockSpec(w0.shape, lambda i: (0, 0)),
            pl.BlockSpec(bvec.shape, lambda i: (0, 0, 0)),
            pl.BlockSpec(memory_space=pl.ANY),   # wh   stays in HBM, manual DMA
            pl.BlockSpec(memory_space=pl.ANY),   # wpre stays in HBM, manual DMA
        ],
        out_specs=pl.BlockSpec((tb, 1), lambda i: (i, 0)),
        scratch_shapes=[
            pltpu.VMEM((N_HIDDEN, D_MAP2, D_MAP2), jnp.bfloat16),  # wh buffers
            pltpu.VMEM((D_MAP3, MAP_DIM), jnp.bfloat16),           # wpre buffer
            pltpu.SemaphoreType.DMA((N_HIDDEN + 1,)),
        ],
        compiler_params=pltpu.CompilerParams(
            dimension_semantics=("parallel",)),
        cost_estimate=pl.CostEstimate(
            flops=8_200_000, transcendentals=64, bytes_accessed=1_100_000),
    )(x, w0, bvec, wh, wpre)


# ---------------------------- parameter init ----------------------------
def init_params(key):
    """Unpacked f32 params in [in, out] layout (PyTorch nn.Linear semantics)."""
    ks = iter(jax.random.split(key, 32))

    def lin_w(fan_in, fan_out):
        return jax.random.normal(next(ks), (fan_in, fan_out), jnp.float32) * 0.02

    def lin_b(fan_out):
        return jax.random.normal(next(ks), (1, fan_out), jnp.float32) * 0.02

    m = MAP_DIM
    wi0 = lin_w(D_VISION, m); bi0 = lin_b(m)
    wih = jnp.stack([lin_w(m, m) for _ in range(N_HIDDEN)])
    bih = jnp.concatenate([lin_b(m) for _ in range(N_HIDDEN)], axis=0)   # [4, m]
    wt0 = lin_w(D_TEXT, m); bt0 = lin_b(m)
    wth = jnp.stack([lin_w(m, m) for _ in range(N_HIDDEN)])
    bth = jnp.concatenate([lin_b(m) for _ in range(N_HIDDEN)], axis=0)   # [4, m]
    wq = lin_w(D_QFORMER, m); bq = lin_b(m)
    wpre = lin_w(3 * m, m); bpre = lin_b(m)
    wcls = lin_b(m)          # stored as [1, m] row vector
    bcls = lin_b(1)          # [1, 1]
    return (wi0, bi0, wih, bih, wt0, bt0, wth, bth,
            wq, bq, wpre, bpre, wcls, bcls)


def pack_params(params):
    """Host-side packing: block-diag fused bf16 weights + one f32 bias slab
    pre-broadcast over the batch."""
    (wi0, bi0, wih, bih, wt0, bt0, wth, bth,
     wq, bq, wpre, bpre, wcls, bcls) = params
    m = MAP_DIM

    def block_diag(*mats):
        rows = sum(a.shape[0] for a in mats)
        cols = sum(a.shape[1] for a in mats)
        out = jnp.zeros((rows, cols), jnp.float32)
        r = c = 0
        for a in mats:
            out = out.at[r:r + a.shape[0], c:c + a.shape[1]].set(a)
            r += a.shape[0]
            c += a.shape[1]
        return out

    w0 = block_diag(wi0, wt0, wq).astype(jnp.bfloat16)                   # [512, 384]
    wh = jnp.stack([block_diag(wih[i], wth[i]) for i in range(N_HIDDEN)]
                   ).astype(jnp.bfloat16)                                # [4, 256, 256]
    wpre_b = wpre.astype(jnp.bfloat16)                                   # [384, 128]

    # packed bias slab [6, 384] (f32):
    #   row 0        : [bi0 | bt0 | bq]
    #   rows 1..4    : [bih[i] | bth[i] | 0]
    #   row 5        : [bpre | wcls | (bcls at lane 0, rest 0)]
    b0 = jnp.concatenate([bi0, bt0, bq], axis=-1)                        # [1, 384]
    bh = jnp.concatenate(
        [jnp.concatenate([bih, bth], axis=-1),
         jnp.zeros((N_HIDDEN, m), jnp.float32)], axis=-1)                # [4, 384]
    bcls_row = jnp.zeros((1, m), jnp.float32).at[0, 0].set(bcls[0, 0])
    last = jnp.concatenate([bpre, wcls, bcls_row], axis=-1)              # [1, 384]
    bvec = jnp.concatenate([b0, bh, last], axis=0)                       # [6, 384]
    # pre-broadcast over the batch so no broadcast sits on the kernel's chain
    bvec = jnp.broadcast_to(bvec[:, None, :], (bvec.shape[0], B, D_MAP3))
    bvec = jnp.asarray(bvec, jnp.float32)                                # [6, B, 384]
    return (w0, wh, wpre_b, bvec)


# ------------------------- pure-JAX reference ---------------------------
def reference(img, txt, qf, params):
    """Faithful f32 re-statement of CustomBLIP.forward (head part)."""
    (wi0, bi0, wih, bih, wt0, bt0, wth, bth,
     wq, bq, wpre, bpre, wcls, bcls) = params

    def mlp(x, w0, b0, wh, bh):
        h = jnp.dot(x, w0, preferred_element_type=jnp.float32) + b0
        for i in range(N_HIDDEN):
            h = jnp.maximum(h, 0.0)
            h = jnp.dot(h, wh[i], preferred_element_type=jnp.float32) + bh[i]
        return h

    def norm(x):
        n = jnp.sqrt(jnp.sum(x * x, axis=-1, keepdims=True))
        return x / jnp.maximum(n, 1e-12)

    img_f = norm(mlp(img, wi0, bi0, wih, bih))
    txt_f = norm(mlp(txt, wt0, bt0, wth, bth))
    qf_f = norm(jnp.dot(qf, wq, preferred_element_type=jnp.float32) + bq)
    feats = jnp.concatenate([img_f, txt_f, qf_f], axis=1)
    h = jnp.maximum(
        jnp.dot(feats, wpre, preferred_element_type=jnp.float32) + bpre, 0.0)
    logits = jnp.sum(h * wcls, axis=-1, keepdims=True) + bcls
    return jax.nn.sigmoid(logits)


if __name__ == "__main__":
    key = jax.random.PRNGKey(0)
    k_img, k_txt, k_qf, k_par = jax.random.split(key, 4)

    # embeddings the frozen BLIP2 backbone would produce for the batch
    image_embeds = jax.random.normal(k_img, (B, D_VISION), jnp.float32)
    text_embeds = jax.random.normal(k_txt, (B, D_TEXT), jnp.float32)
    qformer_feats = jax.random.normal(k_qf, (B, D_QFORMER), jnp.float32)

    params = init_params(k_par)
    packed = pack_params(params)

    pred = custom_blip_head(image_embeds, text_embeds, qformer_feats, packed)
    pred = jax.block_until_ready(pred)

    ref = reference(image_embeds, text_embeds, qformer_feats, params)
    assert pred.shape == (B, 1)
    assert bool(jnp.all(jnp.isfinite(pred)))
    max_err = float(jnp.max(jnp.abs(pred - ref)))
    assert max_err < 5e-3, f"max abs diff {max_err}"

    print("KERNEL_OK")
</pallas_src>

<mosaic_0001>
module attributes {stable_mosaic.version = 11 : i64} {
  func.func @blip_head_kernel(%arg0: i32, %arg1: memref<8x512xbf16, #tpu.memory_space<vmem>>, %arg2: memref<512x384xbf16, #tpu.memory_space<vmem>>, %arg3: memref<6x8x384xf32, #tpu.memory_space<vmem>>, %arg4: memref<4x256x256xbf16, #tpu.memory_space<any>>, %arg5: memref<384x128xbf16, #tpu.memory_space<any>>, %arg6: memref<8x1xf32, #tpu.memory_space<vmem>>, %arg7: memref<4x256x256xbf16, #tpu.memory_space<vmem>>, %arg8: memref<384x128xbf16, #tpu.memory_space<vmem>>, %arg9: memref<5x!tpu.dma_semaphore, #tpu.memory_space<semaphore_mem>>) attributes {dimension_semantics = [#tpu.dimension_semantics<parallel>], iteration_bounds = array<i64: 1>, scalar_prefetch = 0 : i64, scratch_operands = 3 : i64, tpu.core_type = #tpu.core_type<tc>, window_params = [{transform_indices = @transform_0, window_bounds = array<i64: 8, 512>}, {pipeline_mode = #tpu.pipeline_mode<synchronous>, transform_indices = @transform_1, window_bounds = array<i64: 512, 384>}, {pipeline_mode = #tpu.pipeline_mode<synchronous>, transform_indices = @transform_2, window_bounds = array<i64: 6, 8, 384>}, {}, {}, {transform_indices = @transform_5, window_bounds = array<i64: 8, 1>}]} {
    %c0_i32 = arith.constant 0 : i32
    %c0_i32_0 = arith.constant 0 : i32
    %c0_i32_1 = arith.constant 0 : i32
    %c0_i32_2 = arith.constant 0 : i32
    %c0_i32_3 = arith.constant 0 : i32
    %0 = tpu.memref_slice %arg4[%c0_i32, %c0_i32_2, %c0_i32_3] : memref<4x256x256xbf16, #tpu.memory_space<any>> -> memref<1x256x256xbf16, #tpu.memory_space<any>>
    %1 = tpu.memref_squeeze %0 : memref<1x256x256xbf16, #tpu.memory_space<any>> -> memref<256x256xbf16, #tpu.memory_space<any>>
    %c0_i32_4 = arith.constant 0 : i32
    %c0_i32_5 = arith.constant 0 : i32
    %2 = tpu.memref_slice %arg7[%c0_i32_0, %c0_i32_4, %c0_i32_5] : memref<4x256x256xbf16, #tpu.memory_space<vmem>> -> memref<1x256x256xbf16, #tpu.memory_space<vmem>>
    %3 = tpu.memref_squeeze %2 : memref<1x256x256xbf16, #tpu.memory_space<vmem>> -> memref<256x256xbf16, #tpu.memory_space<vmem>>
    %4 = tpu.memref_slice %arg9[%c0_i32_1] : memref<5x!tpu.dma_semaphore, #tpu.memory_space<semaphore_mem>> -> memref<1x!tpu.dma_semaphore, #tpu.memory_space<semaphore_mem>>
    %5 = tpu.memref_squeeze %4 : memref<1x!tpu.dma_semaphore, #tpu.memory_space<semaphore_mem>> -> memref<!tpu.dma_semaphore, #tpu.memory_space<semaphore_mem>>
    tpu.enqueue_dma source(%1 : memref<256x256xbf16, #tpu.memory_space<any>>) target(%3 : memref<256x256xbf16, #tpu.memory_space<vmem>>) target_semaphore(%5 : memref<!tpu.dma_semaphore, #tpu.memory_space<semaphore_mem>>)
    %c1_i32 = arith.constant 1 : i32
    %c1_i32_6 = arith.constant 1 : i32
    %c1_i32_7 = arith.constant 1 : i32
    %c0_i32_8 = arith.constant 0 : i32
    %c0_i32_9 = arith.constant 0 : i32
    %6 = tpu.memref_slice %arg4[%c1_i32, %c0_i32_8, %c0_i32_9] : memref<4x256x256xbf16, #tpu.memory_space<any>> -> memref<1x256x256xbf16, #tpu.memory_space<any>>
    %7 = tpu.memref_squeeze %6 : memref<1x256x256xbf16, #tpu.memory_space<any>> -> memref<256x256xbf16, #tpu.memory_space<any>>
    %c0_i32_10 = arith.constant 0 : i32
    %c0_i32_11 = arith.constant 0 : i32
    %8 = tpu.memref_slice %arg7[%c1_i32_6, %c0_i32_10, %c0_i32_11] : memref<4x256x256xbf16, #tpu.memory_space<vmem>> -> memref<1x256x256xbf16, #tpu.memory_space<vmem>>
    %9 = tpu.memref_squeeze %8 : memref<1x256x256xbf16, #tpu.memory_space<vmem>> -> memref<256x256xbf16, #tpu.memory_space<vmem>>
    %10 = tpu.memref_slice %arg9[%c1_i32_7] : memref<5x!tpu.dma_semaphore, #tpu.memory_space<semaphore_mem>> -> memref<1x!tpu.dma_semaphore, #tpu.memory_space<semaphore_mem>>
    %11 = tpu.memref_squeeze %10 : memref<1x!tpu.dma_semaphore, #tpu.memory_space<semaphore_mem>> -> memref<!tpu.dma_semaphore, #tpu.memory_space<semaphore_mem>>
    tpu.enqueue_dma source(%7 : memref<256x256xbf16, #tpu.memory_space<any>>) target(%9 : memref<256x256xbf16, #tpu.memory_space<vmem>>) target_semaphore(%11 : memref<!tpu.dma_semaphore, #tpu.memory_space<semaphore_mem>>)
    %c2_i32 = arith.constant 2 : i32
    %c2_i32_12 = arith.constant 2 : i32
    %c2_i32_13 = arith.constant 2 : i32
    %c0_i32_14 = arith.constant 0 : i32
    %c0_i32_15 = arith.constant 0 : i32
    %12 = tpu.memref_slice %arg4[%c2_i32, %c0_i32_14, %c0_i32_15] : memref<4x256x256xbf16, #tpu.memory_space<any>> -> memref<1x256x256xbf16, #tpu.memory_space<any>>
    %13 = tpu.memref_squeeze %12 : memref<1x256x256xbf16, #tpu.memory_space<any>> -> memref<256x256xbf16, #tpu.memory_space<any>>
    %c0_i32_16 = arith.constant 0 : i32
    %c0_i32_17 = arith.constant 0 : i32
    %14 = tpu.memref_slice %arg7[%c2_i32_12, %c0_i32_16, %c0_i32_17] : memref<4x256x256xbf16, #tpu.memory_space<vmem>> -> memref<1x256x256xbf16, #tpu.memory_space<vmem>>
    %15 = tpu.memref_squeeze %14 : memref<1x256x256xbf16, #tpu.memory_space<vmem>> -> memref<256x256xbf16, #tpu.memory_space<vmem>>
    %16 = tpu.memref_slice %arg9[%c2_i32_13] : memref<5x!tpu.dma_semaphore, #tpu.memory_space<semaphore_mem>> -> memref<1x!tpu.dma_semaphore, #tpu.memory_space<semaphore_mem>>
    %17 = tpu.memref_squeeze %16 : memref<1x!tpu.dma_semaphore, #tpu.memory_space<semaphore_mem>> -> memref<!tpu.dma_semaphore, #tpu.memory_space<semaphore_mem>>
    tpu.enqueue_dma source(%13 : memref<256x256xbf16, #tpu.memory_space<any>>) target(%15 : memref<256x256xbf16, #tpu.memory_space<vmem>>) target_semaphore(%17 : memref<!tpu.dma_semaphore, #tpu.memory_space<semaphore_mem>>)
    %c3_i32 = arith.constant 3 : i32
    %c3_i32_18 = arith.constant 3 : i32
    %c3_i32_19 = arith.constant 3 : i32
    %c0_i32_20 = arith.constant 0 : i32
    %c0_i32_21 = arith.constant 0 : i32
    %18 = tpu.memref_slice %arg4[%c3_i32, %c0_i32_20, %c0_i32_21] : memref<4x256x256xbf16, #tpu.memory_space<any>> -> memref<1x256x256xbf16, #tpu.memory_space<any>>
    %19 = tpu.memref_squeeze %18 : memref<1x256x256xbf16, #tpu.memory_space<any>> -> memref<256x256xbf16, #tpu.memory_space<any>>
    %c0_i32_22 = arith.constant 0 : i32
    %c0_i32_23 = arith.constant 0 : i32
    %20 = tpu.memref_slice %arg7[%c3_i32_18, %c0_i32_22, %c0_i32_23] : memref<4x256x256xbf16, #tpu.memory_space<vmem>> -> memref<1x256x256xbf16, #tpu.memory_space<vmem>>
    %21 = tpu.memref_squeeze %20 : memref<1x256x256xbf16, #tpu.memory_space<vmem>> -> memref<256x256xbf16, #tpu.memory_space<vmem>>
    %22 = tpu.memref_slice %arg9[%c3_i32_19] : memref<5x!tpu.dma_semaphore, #tpu.memory_space<semaphore_mem>> -> memref<1x!tpu.dma_semaphore, #tpu.memory_space<semaphore_mem>>
    %23 = tpu.memref_squeeze %22 : memref<1x!tpu.dma_semaphore, #tpu.memory_space<semaphore_mem>> -> memref<!tpu.dma_semaphore, #tpu.memory_space<semaphore_mem>>
    tpu.enqueue_dma source(%19 : memref<256x256xbf16, #tpu.memory_space<any>>) target(%21 : memref<256x256xbf16, #tpu.memory_space<vmem>>) target_semaphore(%23 : memref<!tpu.dma_semaphore, #tpu.memory_space<semaphore_mem>>)
    %c4_i32 = arith.constant 4 : i32
    %24 = tpu.memref_slice %arg9[%c4_i32] : memref<5x!tpu.dma_semaphore, #tpu.memory_space<semaphore_mem>> -> memref<1x!tpu.dma_semaphore, #tpu.memory_space<semaphore_mem>>
    %25 = tpu.memref_squeeze %24 : memref<1x!tpu.dma_semaphore, #tpu.memory_space<semaphore_mem>> -> memref<!tpu.dma_semaphore, #tpu.memory_space<semaphore_mem>>
    tpu.enqueue_dma source(%arg5 : memref<384x128xbf16, #tpu.memory_space<any>>) target(%arg8 : memref<384x128xbf16, #tpu.memory_space<vmem>>) target_semaphore(%25 : memref<!tpu.dma_semaphore, #tpu.memory_space<semaphore_mem>>)
    %c0 = arith.constant 0 : index
    %c0_24 = arith.constant 0 : index
    %26 = vector.load %arg1[%c0, %c0_24] : memref<8x512xbf16, #tpu.memory_space<vmem>>, vector<8x512xbf16>
    %c0_25 = arith.constant 0 : index
    %c0_26 = arith.constant 0 : index
    %27 = vector.load %arg2[%c0_25, %c0_26] : memref<512x384xbf16, #tpu.memory_space<vmem>>, vector<512x384xbf16>
    %cst = arith.constant dense<0.000000e+00> : vector<8x384xf32>
    %28 = tpu.matmul %26, %27, %cst {dimension_numbers = #tpu.dot_dimension_numbers<[1], [0], [0], [1], [0, 0, 1, 1], [], []>} : vector<8x512xbf16>, vector<512x384xbf16>, vector<8x384xf32> -> vector<8x384xf32>
    %c0_27 = arith.constant 0 : index
    %c0_28 = arith.constant 0 : index
    %c0_29 = arith.constant 0 : index
    %29 = vector.load %arg3[%c0_27, %c0_28, %c0_29] : memref<6x8x384xf32, #tpu.memory_space<vmem>>, vector<1x8x384xf32>
    %30 = vector.shape_cast %29 : vector<1x8x384xf32> to vector<8x384xf32>
    %31 = arith.addf %28, %30 : vector<8x384xf32>
    %32 = vector.extract_strided_slice %31 {offsets = [0, 0], sizes = [8, 256], strides = [1, 1]} : vector<8x384xf32> to vector<8x256xf32>
    %33 = vector.extract_strided_slice %31 {offsets = [0, 256], sizes = [8, 128], strides = [1, 1]} : vector<8x384xf32> to vector<8x128xf32>
    %cst_30 = arith.constant 0.000000e+00 : f32
    %34 = vector.broadcast %cst_30 : f32 to vector<8x256xf32>
    %35 = arith.maximumf %32, %34 : vector<8x256xf32>
    %c0_i32_31 = arith.constant 0 : i32
    %c0_i32_32 = arith.constant 0 : i32
    %c0_i32_33 = arith.constant 0 : i32
    %c0_i32_34 = arith.constant 0 : i32
    %c0_i32_35 = arith.constant 0 : i32
    %36 = tpu.memref_slice %arg4[%c0_i32_31, %c0_i32_34, %c0_i32_35] : memref<4x256x256xbf16, #tpu.memory_space<any>> -> memref<1x256x256xbf16, #tpu.memory_space<any>>
    %37 = tpu.memref_squeeze %36 : memref<1x256x256xbf16, #tpu.memory_space<any>> -> memref<256x256xbf16, #tpu.memory_space<any>>
    %c0_i32_36 = arith.constant 0 : i32
    %c0_i32_37 = arith.constant 0 : i32
    %38 = tpu.memref_slice %arg7[%c0_i32_32, %c0_i32_36, %c0_i32_37] : memref<4x256x256xbf16, #tpu.memory_space<vmem>> -> memref<1x256x256xbf16, #tpu.memory_space<vmem>>
    %39 = tpu.memref_squeeze %38 : memref<1x256x256xbf16, #tpu.memory_space<vmem>> -> memref<256x256xbf16, #tpu.memory_space<vmem>>
    %40 = tpu.memref_slice %arg9[%c0_i32_33] : memref<5x!tpu.dma_semaphore, #tpu.memory_space<semaphore_mem>> -> memref<1x!tpu.dma_semaphore, #tpu.memory_space<semaphore_mem>>
    %41 = tpu.memref_squeeze %40 : memref<1x!tpu.dma_semaphore, #tpu.memory_space<semaphore_mem>> -> memref<!tpu.dma_semaphore, #tpu.memory_space<semaphore_mem>>
    tpu.wait_dma2 semaphore(%41 : memref<!tpu.dma_semaphore, #tpu.memory_space<semaphore_mem>>) src(%37 : memref<256x256xbf16, #tpu.memory_space<any>>) dst(%39 : memref<256x256xbf16, #tpu.memory_space<vmem>>)
    %c1 = arith.constant 1 : index
    %c0_38 = arith.constant 0 : index
    %c0_39 = arith.constant 0 : index
    %42 = vector.load %arg3[%c1, %c0_38, %c0_39] : memref<6x8x384xf32, #tpu.memory_space<vmem>>, vector<1x8x384xf32>
    %43 = vector.shape_cast %42 : vector<1x8x384xf32> to vector<8x384xf32>
    %44 = arith.truncf %35 : vector<8x256xf32> to vector<8x256xbf16>
    %c0_40 = arith.constant 0 : index
    %c0_41 = arith.constant 0 : index
    %c0_42 = arith.constant 0 : index
    %45 = vector.load %arg7[%c0_40, %c0_41, %c0_42] : memref<4x256x256xbf16, #tpu.memory_space<vmem>>, vector<1x256x256xbf16>
    %46 = vector.shape_cast %45 : vector<1x256x256xbf16> to vector<256x256xbf16>
    %cst_43 = arith.constant dense<0.000000e+00> : vector<8x256xf32>
    %47 = tpu.matmul %44, %46, %cst_43 {dimension_numbers = #tpu.dot_dimension_numbers<[1], [0], [0], [1], [0, 0, 1, 1], [], []>} : vector<8x256xbf16>, vector<256x256xbf16>, vector<8x256xf32> -> vector<8x256xf32>
    %48 = vector.extract_strided_slice %43 {offsets = [0, 0], sizes = [8, 256], strides = [1, 1]} : vector<8x384xf32> to vector<8x256xf32>
    %49 = arith.addf %47, %48 : vector<8x256xf32>
    %cst_44 = arith.constant 0.000000e+00 : f32
    %50 = vector.broadcast %cst_44 : f32 to vector<8x256xf32>
    %51 = arith.maximumf %49, %50 : vector<8x256xf32>
    %c1_i32_45 = arith.constant 1 : i32
    %c1_i32_46 = arith.constant 1 : i32
    %c1_i32_47 = arith.constant 1 : i32
    %c0_i32_48 = arith.constant 0 : i32
    %c0_i32_49 = arith.constant 0 : i32
    %52 = tpu.memref_slice %arg4[%c1_i32_45, %c0_i32_48, %c0_i32_49] : memref<4x256x256xbf16, #tpu.memory_space<any>> -> memref<1x256x256xbf16, #tpu.memory_space<any>>
    %53 = tpu.memref_squeeze %52 : memref<1x256x256xbf16, #tpu.memory_space<any>> -> memref<256x256xbf16, #tpu.memory_space<any>>
    %c0_i32_50 = arith.constant 0 : i32
    %c0_i32_51 = arith.constant 0 : i32
    %54 = tpu.memref_slice %arg7[%c1_i32_46, %c0_i32_50, %c0_i32_51] : memref<4x256x256xbf16, #tpu.memory_space<vmem>> -> memref<1x256x256xbf16, #tpu.memory_space<vmem>>
    %55 = tpu.memref_squeeze %54 : memref<1x256x256xbf16, #tpu.memory_space<vmem>> -> memref<256x256xbf16, #tpu.memory_space<vmem>>
    %56 = tpu.memref_slice %arg9[%c1_i32_47] : memref<5x!tpu.dma_semaphore, #tpu.memory_space<semaphore_mem>> -> memref<1x!tpu.dma_semaphore, #tpu.memory_space<semaphore_mem>>
    %57 = tpu.memref_squeeze %56 : memref<1x!tpu.dma_semaphore, #tpu.memory_space<semaphore_mem>> -> memref<!tpu.dma_semaphore, #tpu.memory_space<semaphore_mem>>
    tpu.wait_dma2 semaphore(%57 : memref<!tpu.dma_semaphore, #tpu.memory_space<semaphore_mem>>) src(%53 : memref<256x256xbf16, #tpu.memory_space<any>>) dst(%55 : memref<256x256xbf16, #tpu.memory_space<vmem>>)
    %c2 = arith.constant 2 : index
    %c0_52 = arith.constant 0 : index
    %c0_53 = arith.constant 0 : index
    %58 = vector.load %arg3[%c2, %c0_52, %c0_53] : memref<6x8x384xf32, #tpu.memory_space<vmem>>, vector<1x8x384xf32>
    %59 = vector.shape_cast %58 : vector<1x8x384xf32> to vector<8x384xf32>
    %60 = arith.truncf %51 : vector<8x256xf32> to vector<8x256xbf16>
    %c1_54 = arith.constant 1 : index
    %c0_55 = arith.constant 0 : index
    %c0_56 = arith.constant 0 : index
    %61 = vector.load %arg7[%c1_54, %c0_55, %c0_56] : memref<4x256x256xbf16, #tpu.memory_space<vmem>>, vector<1x256x256xbf16>
    %62 = vector.shape_cast %61 : vector<1x256x256xbf16> to vector<256x256xbf16>
    %cst_57 = arith.constant dense<0.000000e+00> : vector<8x256xf32>
    %63 = tpu.matmul %60, %62, %cst_57 {dimension_numbers = #tpu.dot_dimension_numbers<[1], [0], [0], [1], [0, 0, 1, 1], [], []>} : vector<8x256xbf16>, vector<256x256xbf16>, vector<8x256xf32> -> vector<8x256xf32>
    %64 = vector.extract_strided_slice %59 {offsets = [0, 0], sizes = [8, 256], strides = [1, 1]} : vector<8x384xf32> to vector<8x256xf32>
    %65 = arith.addf %63, %64 : vector<8x256xf32>
    %cst_58 = arith.constant 0.000000e+00 : f32
    %66 = vector.broadcast %cst_58 : f32 to vector<8x256xf32>
    %67 = arith.maximumf %65, %66 : vector<8x256xf32>
    %c2_i32_59 = arith.constant 2 : i32
    %c2_i32_60 = arith.constant 2 : i32
    %c2_i32_61 = arith.constant 2 : i32
    %c0_i32_62 = arith.constant 0 : i32
    %c0_i32_63 = arith.constant 0 : i32
    %68 = tpu.memref_slice %arg4[%c2_i32_59, %c0_i32_62, %c0_i32_63] : memref<4x256x256xbf16, #tpu.memory_space<any>> -> memref<1x256x256xbf16, #tpu.memory_space<any>>
    %69 = tpu.memref_squeeze %68 : memref<1x256x256xbf16, #tpu.memory_space<any>> -> memref<256x256xbf16, #tpu.memory_space<any>>
    %c0_i32_64 = arith.constant 0 : i32
    %c0_i32_65 = arith.constant 0 : i32
    %70 = tpu.memref_slice %arg7[%c2_i32_60, %c0_i32_64, %c0_i32_65] : memref<4x256x256xbf16, #tpu.memory_space<vmem>> -> memref<1x256x256xbf16, #tpu.memory_space<vmem>>
    %71 = tpu.memref_squeeze %70 : memref<1x256x256xbf16, #tpu.memory_space<vmem>> -> memref<256x256xbf16, #tpu.memory_space<vmem>>
    %72 = tpu.memref_slice %arg9[%c2_i32_61] : memref<5x!tpu.dma_semaphore, #tpu.memory_space<semaphore_mem>> -> memref<1x!tpu.dma_semaphore, #tpu.memory_space<semaphore_mem>>
    %73 = tpu.memref_squeeze %72 : memref<1x!tpu.dma_semaphore, #tpu.memory_space<semaphore_mem>> -> memref<!tpu.dma_semaphore, #tpu.memory_space<semaphore_mem>>
    tpu.wait_dma2 semaphore(%73 : memref<!tpu.dma_semaphore, #tpu.memory_space<semaphore_mem>>) src(%69 : memref<256x256xbf16, #tpu.memory_space<any>>) dst(%71 : memref<256x256xbf16, #tpu.memory_space<vmem>>)
    %c3 = arith.constant 3 : index
    %c0_66 = arith.constant 0 : index
    %c0_67 = arith.constant 0 : index
    %74 = vector.load %arg3[%c3, %c0_66, %c0_67] : memref<6x8x384xf32, #tpu.memory_space<vmem>>, vector<1x8x384xf32>
    %75 = vector.shape_cast %74 : vector<1x8x384xf32> to vector<8x384xf32>
    %76 = arith.truncf %67 : vector<8x256xf32> to vector<8x256xbf16>
    %c2_68 = arith.constant 2 : index
    %c0_69 = arith.constant 0 : index
    %c0_70 = arith.constant 0 : index
    %77 = vector.load %arg7[%c2_68, %c0_69, %c0_70] : memref<4x256x256xbf16, #tpu.memory_space<vmem>>, vector<1x256x256xbf16>
    %78 = vector.shape_cast %77 : vector<1x256x256xbf16> to vector<256x256xbf16>
    %cst_71 = arith.constant dense<0.000000e+00> : vector<8x256xf32>
    %79 = tpu.matmul %76, %78, %cst_71 {dimension_numbers = #tpu.dot_dimension_numbers<[1], [0], [0], [1], [0, 0, 1, 1], [], []>} : vector<8x256xbf16>, vector<256x256xbf16>, vector<8x256xf32> -> vector<8x256xf32>
    %80 = vector.extract_strided_slice %75 {offsets = [0, 0], sizes = [8, 256], strides = [1, 1]} : vector<8x384xf32> to vector<8x256xf32>
    %81 = arith.addf %79, %80 : vector<8x256xf32>
    %cst_72 = arith.constant 0.000000e+00 : f32
    %82 = vector.broadcast %cst_72 : f32 to vector<8x256xf32>
    %83 = arith.maximumf %81, %82 : vector<8x256xf32>
    %c3_i32_73 = arith.constant 3 : i32
    %c3_i32_74 = arith.constant 3 : i32
    %c3_i32_75 = arith.constant 3 : i32
    %c0_i32_76 = arith.constant 0 : i32
    %c0_i32_77 = arith.constant 0 : i32
    %84 = tpu.memref_slice %arg4[%c3_i32_73, %c0_i32_76, %c0_i32_77] : memref<4x256x256xbf16, #tpu.memory_space<any>> -> memref<1x256x256xbf16, #tpu.memory_space<any>>
    %85 = tpu.memref_squeeze %84 : memref<1x256x256xbf16, #tpu.memory_space<any>> -> memref<256x256xbf16, #tpu.memory_space<any>>
    %c0_i32_78 = arith.constant 0 : i32
    %c0_i32_79 = arith.constant 0 : i32
    %86 = tpu.memref_slice %arg7[%c3_i32_74, %c0_i32_78, %c0_i32_79] : memref<4x256x256xbf16, #tpu.memory_space<vmem>> -> memref<1x256x256xbf16, #tpu.memory_space<vmem>>
    %87 = tpu.memref_squeeze %86 : memref<1x256x256xbf16, #tpu.memory_space<vmem>> -> memref<256x256xbf16, #tpu.memory_space<vmem>>
    %88 = tpu.memref_slice %arg9[%c3_i32_75] : memref<5x!tpu.dma_semaphore, #tpu.memory_space<semaphore_mem>> -> memref<1x!tpu.dma_semaphore, #tpu.memory_space<semaphore_mem>>
    %89 = tpu.memref_squeeze %88 : memref<1x!tpu.dma_semaphore, #tpu.memory_space<semaphore_mem>> -> memref<!tpu.dma_semaphore, #tpu.memory_space<semaphore_mem>>
    tpu.wait_dma2 semaphore(%89 : memref<!tpu.dma_semaphore, #tpu.memory_space<semaphore_mem>>) src(%85 : memref<256x256xbf16, #tpu.memory_space<any>>) dst(%87 : memref<256x256xbf16, #tpu.memory_space<vmem>>)
    %c4 = arith.constant 4 : index
    %c0_80 = arith.constant 0 : index
    %c0_81 = arith.constant 0 : index
    %90 = vector.load %arg3[%c4, %c0_80, %c0_81] : memref<6x8x384xf32, #tpu.memory_space<vmem>>, vector<1x8x384xf32>
    %91 = vector.shape_cast %90 : vector<1x8x384xf32> to vector<8x384xf32>
    %92 = arith.truncf %83 : vector<8x256xf32> to vector<8x256xbf16>
    %c3_82 = arith.constant 3 : index
    %c0_83 = arith.constant 0 : index
    %c0_84 = arith.constant 0 : index
    %93 = vector.load %arg7[%c3_82, %c0_83, %c0_84] : memref<4x256x256xbf16, #tpu.memory_space<vmem>>, vector<1x256x256xbf16>
    %94 = vector.shape_cast %93 : vector<1x256x256xbf16> to vector<256x256xbf16>
    %cst_85 = arith.constant dense<0.000000e+00> : vector<8x256xf32>
    %95 = tpu.matmul %92, %94, %cst_85 {dimension_numbers = #tpu.dot_dimension_numbers<[1], [0], [0], [1], [0, 0, 1, 1], [], []>} : vector<8x256xbf16>, vector<256x256xbf16>, vector<8x256xf32> -> vector<8x256xf32>
    %96 = vector.extract_strided_slice %91 {offsets = [0, 0], sizes = [8, 256], strides = [1, 1]} : vector<8x384xf32> to vector<8x256xf32>
    %97 = arith.addf %95, %96 : vector<8x256xf32>
    %98 = vector.extract_strided_slice %97 {offsets = [0, 0], sizes = [8, 128], strides = [1, 1]} : vector<8x256xf32> to vector<8x128xf32>
    %99 = arith.mulf %98, %98 : vector<8x128xf32>
    %cst_86 = arith.constant dense<0.000000e+00> : vector<8xf32>
    %100 = vector.multi_reduction <add>, %99, %cst_86 [1] : vector<8x128xf32> to vector<8xf32>
    %101 = vector.shape_cast %100 : vector<8xf32> to vector<8x1xf32>
    %cst_87 = arith.constant 1.000000e-24 : f32
    %102 = vector.broadcast %cst_87 : f32 to vector<8x1xf32>
    %103 = arith.maximumf %101, %102 : vector<8x1xf32>
    %104 = math.rsqrt %103 : vector<8x1xf32>
    %105 = vector.broadcast %104 : vector<8x1xf32> to vector<8x128xf32>
    %106 = arith.mulf %98, %105 : vector<8x128xf32>
    %107 = vector.extract_strided_slice %97 {offsets = [0, 128], sizes = [8, 128], strides = [1, 1]} : vector<8x256xf32> to vector<8x128xf32>
    %108 = arith.mulf %107, %107 : vector<8x128xf32>
    %cst_88 = arith.constant dense<0.000000e+00> : vector<8xf32>
    %109 = vector.multi_reduction <add>, %108, %cst_88 [1] : vector<8x128xf32> to vector<8xf32>
    %110 = vector.shape_cast %109 : vector<8xf32> to vector<8x1xf32>
    %cst_89 = arith.constant 1.000000e-24 : f32
    %111 = vector.broadcast %cst_89 : f32 to vector<8x1xf32>
    %112 = arith.maximumf %110, %111 : vector<8x1xf32>
    %113 = math.rsqrt %112 : vector<8x1xf32>
    %114 = vector.broadcast %113 : vector<8x1xf32> to vector<8x128xf32>
    %115 = arith.mulf %107, %114 : vector<8x128xf32>
    %116 = arith.mulf %33, %33 : vector<8x128xf32>
    %cst_90 = arith.constant dense<0.000000e+00> : vector<8xf32>
    %117 = vector.multi_reduction <add>, %116, %cst_90 [1] : vector<8x128xf32> to vector<8xf32>
    %118 = vector.shape_cast %117 : vector<8xf32> to vector<8x1xf32>
    %cst_91 = arith.constant 1.000000e-24 : f32
    %119 = vector.broadcast %cst_91 : f32 to vector<8x1xf32>
    %120 = arith.maximumf %118, %119 : vector<8x1xf32>
    %121 = math.rsqrt %120 : vector<8x1xf32>
    %122 = vector.broadcast %121 : vector<8x1xf32> to vector<8x128xf32>
    %123 = arith.mulf %33, %122 : vector<8x128xf32>
    %124 = tpu.concatenate %106, %115, %123 in 1 : vector<8x128xf32>, vector<8x128xf32>, vector<8x128xf32> -> vector<8x384xf32>
    %c5 = arith.constant 5 : index
    %c0_92 = arith.constant 0 : index
    %c0_93 = arith.constant 0 : index
    %125 = vector.load %arg3[%c5, %c0_92, %c0_93] : memref<6x8x384xf32, #tpu.memory_space<vmem>>, vector<1x8x384xf32>
    %126 = vector.shape_cast %125 : vector<1x8x384xf32> to vector<8x384xf32>
    %c4_i32_94 = arith.constant 4 : i32
    %127 = tpu.memref_slice %arg9[%c4_i32_94] : memref<5x!tpu.dma_semaphore, #tpu.memory_space<semaphore_mem>> -> memref<1x!tpu.dma_semaphore, #tpu.memory_space<semaphore_mem>>
    %128 = tpu.memref_squeeze %127 : memref<1x!tpu.dma_semaphore, #tpu.memory_space<semaphore_mem>> -> memref<!tpu.dma_semaphore, #tpu.memory_space<semaphore_mem>>
    tpu.wait_dma2 semaphore(%128 : memref<!tpu.dma_semaphore, #tpu.memory_space<semaphore_mem>>) src(%arg5 : memref<384x128xbf16, #tpu.memory_space<any>>) dst(%arg8 : memref<384x128xbf16, #tpu.memory_space<vmem>>)
    %129 = arith.truncf %124 : vector<8x384xf32> to vector<8x384xbf16>
    %c0_95 = arith.constant 0 : index
    %c0_96 = arith.constant 0 : index
    %130 = vector.load %arg8[%c0_95, %c0_96] : memref<384x128xbf16, #tpu.memory_space<vmem>>, vector<384x128xbf16>
    %cst_97 = arith.constant dense<0.000000e+00> : vector<8x128xf32>
    %131 = tpu.matmul %129, %130, %cst_97 {dimension_numbers = #tpu.dot_dimension_numbers<[1], [0], [0], [1], [0, 0, 1, 1], [], []>} : vector<8x384xbf16>, vector<384x128xbf16>, vector<8x128xf32> -> vector<8x128xf32>
    %132 = vector.extract_strided_slice %126 {offsets = [0, 0], sizes = [8, 128], strides = [1, 1]} : vector<8x384xf32> to vector<8x128xf32>
    %133 = arith.addf %131, %132 : vector<8x128xf32>
    %cst_98 = arith.constant 0.000000e+00 : f32
    %134 = vector.broadcast %cst_98 : f32 to vector<8x128xf32>
    %135 = arith.maximumf %133, %134 : vector<8x128xf32>
    %136 = vector.extract_strided_slice %126 {offsets = [0, 128], sizes = [8, 128], strides = [1, 1]} : vector<8x384xf32> to vector<8x128xf32>
    %137 = vector.extract_strided_slice %126 {offsets = [0, 256], sizes = [8, 128], strides = [1, 1]} : vector<8x384xf32> to vector<8x128xf32>
    %138 = arith.mulf %135, %136 : vector<8x128xf32>
    %139 = arith.addf %138, %137 : vector<8x128xf32>
    %cst_99 = arith.constant dense<0.000000e+00> : vector<8xf32>
    %140 = vector.multi_reduction <add>, %139, %cst_99 [1] : vector<8x128xf32> to vector<8xf32>
    %141 = vector.shape_cast %140 : vector<8xf32> to vector<8x1xf32>
    %142 = arith.negf %141 : vector<8x1xf32>
    %143 = math.exp %142 : vector<8x1xf32>
    %cst_100 = arith.constant 1.000000e+00 : f32
    %144 = vector.broadcast %cst_100 : f32 to vector<8x1xf32>
    %145 = arith.addf %144, %143 : vector<8x1xf32>
    %146 = arith.divf %144, %145 : vector<8x1xf32>
    %c0_101 = arith.constant 0 : index
    %c0_102 = arith.constant 0 : index
    %147 = vector.load %arg6[%c0_101, %c0_102] : memref<8x1xf32, #tpu.memory_space<vmem>>, vector<8x1xf32>
    tpu.vector_store %arg6[%c0_101, %c0_102], %146 {strides = array<i32>} : memref<8x1xf32, #tpu.memory_space<vmem>>, vector<8x1xf32>,
    return
  }
  func.func @transform_0(%arg0: i32) -> (i32, i32) {
    %c0_i32 = arith.constant 0 : i32
    %c0_i32_0 = arith.constant 0 : i32
    return %arg0, %c0_i32 : i32, i32
  }
  func.func @transform_1(%arg0: i32) -> (i32, i32) {
    %c0_i32 = arith.constant 0 : i32
    %c0_i32_0 = arith.constant 0 : i32
    %c0_i32_1 = arith.constant 0 : i32
    return %c0_i32, %c0_i32_0 : i32, i32
  }
  func.func @transform_2(%arg0: i32) -> (i32, i32, i32) {
    %c0_i32 = arith.constant 0 : i32
    %c0_i32_0 = arith.constant 0 : i32
    %c0_i32_1 = arith.constant 0 : i32
    %c0_i32_2 = arith.constant 0 : i32
    return %c0_i32, %c0_i32_0, %c0_i32_1 : i32, i32, i32
  }
  func.func @transform_5(%arg0: i32) -> (i32, i32) {
    %c0_i32 = arith.constant 0 : i32
    %c0_i32_0 = arith.constant 0 : i32
    return %arg0, %c0_i32 : i32, i32
  }
}

</mosaic_0001>

<bundles_post_ra>
// kernel: tpu_custom_call.1
= control target key start
LH: loop header
LB: loop body
LE: loop exit
PB: predicated region body
PF: predicated region fallthrough
CT: control target
= control target key end

     0   :  { %10 = vsyncpa [#allocation6], 0  ;;  %s2241_s0 = inlined_call_operand.hbm [shape: bf16[8,512], index: 0, kind: input, shape index: {}]   ;;  %s2242_s1 = inlined_call_operand.hbm [shape: bf16[512,384], index: 1, kind: input, shape index: {}]   ;;  %s2243_s2 = inlined_call_operand.hbm [shape: f32[6,8,384], index: 2, kind: input, shape index: {}]   ;;  %s2244_s3 = inlined_call_operand.hbm [shape: bf16[4,256,256], index: 3, kind: input, shape index: {}]   ;;  %s2245_s4 = inlined_call_operand.hbm [shape: bf16[384,128], index: 4, kind: input, shape index: {}]   ;;  %s2246_s5 = inlined_call_operand.vmem [shape: f32[8,1], index: 5, kind: output, shape index: {}]  }
   0x1   :  { %11 = vsyncpa [#allocation8], 0  ;;  %s2037_s18 = smov [#allocation7]   ;;  %s1935_s22 = scalar_lea.hbm %s2242_s1, 12288 }
   0x2   :  { %s27_s19 = sshll.u32 %s2037_s18, 4  ;;  %p1936_p0 = scmp.ne.s32.totalorder %s2242_s1, %s1935_s22  ;;  %s28_s19 = int_to_ptr.vmem [resolvable:$true] %s27_s19 }
   0x3   :  { %p1939_p1 = scmp.lt.u32.totalorder %s1935_s22, %s2242_s1 }
   0x5   :  { %p1941_p2 = pnand %p1939_p1, %p1936_p0 }
   0x7   :  { %1944 = shalt.err (!%p1941_p2)
}
   0x8   :  { %s1945_s27 = scalar_lea.vmem %s28_s19, 12288  ;;  %p1950_p4 = scmp.lt.s32.totalorder %s28_s19, %s28_s19 }
   0x9   :  { %p1946_p3 = scmp.ne.s32.totalorder %s28_s19, %s1945_s27  ;;  %p1951_p5 = scmp.lt.s32.totalorder %s1945_s27, %s1945_s27 }
   0xb   :  { %p1952_p6 = por %p1951_p5, %p1950_p4 }
   0xd   :  { %p1953_p7 = pnand %p1952_p6, %p1946_p3 }
   0xf   :  { %1956 = shalt.err (!%p1953_p7)
}
  0x10   :  { %s2038_s28 = smov 192   ;;  %s2039_s29 = smov 12  }
  0x11   :  { %33 = dma.hbm_to_vmem [thread:$0]  %s2242_s1, 12288, %s28_s19, [#allocation8], %s2038_s28, %s2038_s28, %s2039_s29  }
  0x12   :  { %s2040_s7 = smov [#allocation5]   ;;  %s2041_s9 = smov [#allocation9]  }
  0x13   :  { %s18_s8 = sshll.u32 %s2040_s7, 4  ;;  %s39_s10 = sshll.u32 %s2041_s9, 4  ;;  %s19_s8 = int_to_ptr.vmem [resolvable:$true] %s18_s8  ;;  %s40_s10 = int_to_ptr.vmem [resolvable:$true] %s39_s10 }
  0x14   :  { %s1957_s13 = scalar_lea.hbm %s2241_s0, 256 }
  0x15   :  { %p1958_p8 = scmp.ne.s32.totalorder %s2241_s0, %s1957_s13  ;;  %p1961_p9 = scmp.lt.u32.totalorder %s1957_s13, %s2241_s0 }
  0x17   :  { %p1963_p10 = pnand %p1961_p9, %p1958_p8 }
  0x19   :  { %1966 = shalt.err (!%p1963_p10)
}
  0x1a   :  { %s1967_s1 = scalar_lea.vmem %s19_s8, 256  ;;  %p1972_p12 = scmp.lt.s32.totalorder %s19_s8, %s19_s8 }
  0x1b   :  { %p1968_p11 = scmp.ne.s32.totalorder %s19_s8, %s1967_s1  ;;  %p1973_p13 = scmp.lt.s32.totalorder %s1967_s1, %s1967_s1 }
  0x1d   :  { %p1974_p0 = por %p1973_p13, %p1972_p12 }
  0x1f   :  { %p1975_p1 = pnand %p1974_p0, %p1968_p11 }
  0x21   :  { %1978 = shalt.err (!%p1975_p1)
}
  0x22   :  { %21 = dma.hbm_to_vmem [thread:$0]  %s2241_s0, 256, %s19_s8, [#allocation6]  }
  0x23   :  { %s1979_s22 = scalar_lea.hbm %s2243_s2, 2304 }
  0x24   :  { %p1980_p2 = scmp.ne.s32.totalorder %s2243_s2, %s1979_s22  ;;  %p1983_p3 = scmp.lt.u32.totalorder %s1979_s22, %s2243_s2 }
  0x26   :  { %p1985_p4 = pnand %p1983_p3, %p1980_p2 }
  0x28   :  { %1988 = shalt.err (!%p1985_p4)
}
  0x29   :  { %s1989_s27 = scalar_lea.vmem %s40_s10, 2304  ;;  %p1994_p6 = scmp.lt.s32.totalorder %s40_s10, %s40_s10 }
  0x2a   :  { %p1990_p5 = scmp.ne.s32.totalorder %s40_s10, %s1989_s27  ;;  %p1995_p7 = scmp.lt.s32.totalorder %s1989_s27, %s1989_s27 }
  0x2c   :  { %p1996_p8 = por %p1995_p7, %p1994_p6 }
  0x2e   :  { %p1997_p9 = pnand %p1996_p8, %p1990_p5 }
  0x30   :  { %2000 = shalt.err (!%p1997_p9)
}
  0x31   :  { %s2042_s0 = smov 384   ;;  %s2043_s28 = smov 24  }
  0x32   :  { %45 = dma.hbm_to_vmem [thread:$0]  %s2243_s2, 2304, %s40_s10, [#allocation8], %s2042_s0, %s2042_s0, %s2043_s28  }
  0x33   :  { %2023 = dma.done.wait [#allocation6], 256  }
  0x34   :  { %2024 = vsyncadd [#allocation6], 4294967040 }
  0x35   :  { %2025 = dma.done.wait [#allocation8], 14592  }
  0x36   :  { %2026 = vsyncadd [#allocation8], 4294952704  ;;  %s60_s6 = sld [smem:[#allocation0]]   ;;  %s2044_s7 = smov 256  }
  0x37   :  { %72 = sst [smem:[#allocation11]] %s2044_s7  ;;  %s2045_s8 = smov 2  }
  0x38   :  { %74 = sst [smem:[#allocation11 + $0x1]] %s2044_s7  ;;  %s2046_s9 = smov 64  }
  0x39   :  { %76 = sst [smem:[#allocation11 + $0x2]] %s2045_s8  ;;  %s2047_s11 = smov 128  }
  0x3a   :  { %78 = sst [smem:[#allocation11 + $0x3]] %s2046_s9  ;;  %s2048_s2 = smov [#allocation2]  }
  0x3b   :  { %80 = sst [smem:[#allocation11 + $0x4]] %s2047_s11  ;;  %s68_s10 = sshll.u32 %s2048_s2, 4  ;;  %s69_s10 = int_to_ptr.vmem [resolvable:$true] %s68_s10 }
  0x3c   :  { %82 = sst [smem:[#allocation11 + $0x5]] %s2045_s8  ;;  %s1551_s12 = sshll.u32 %s60_s6, 26 }
  0x3d   :  { %84 = sst [smem:[#allocation11 + $0x6]] %s2047_s11  ;;  %s2137_s13 = sadd.s32 134217728, %s1551_s12 }
  0x3e   :  { %86 = sst [smem:[#allocation11 + $0x7]] %s2046_s9  ;;  %s2049_s14 = smov 4  }
  0x3f   :  { %88 = sst [smem:[#allocation11 + $0x8]] %s2049_s14  ;;  %s2050_s15 = smov [#allocation4]  }
  0x40   :  { %s2051_s16 = smov [#allocation10]   ;;  %s2052_s18 = smov [#allocation2 + $0x100]  }
  0x41   :  { %90 = dma.general %s2244_s3, 4096, %s69_s10, %s2050_s15, %s2051_s16, [#allocation11], %s2137_s13, 0  }
  0x42   :  { %109 = sst [smem:[#allocation13]] %s2044_s7  ;;  %s105_s19 = sshll.u32 %s2052_s18, 4  ;;  %s106_s19 = int_to_ptr.vmem [resolvable:$true] %s105_s19 }
  0x43   :  { %111 = sst [smem:[#allocation13 + $0x1]] %s2044_s7  ;;  %s91_s22 = scalar_lea.hbm %s2244_s3, 4096 }
  0x44   :  { %113 = sst [smem:[#allocation13 + $0x2]] %s2045_s8  ;;  %s2053_s23 = smov [#allocation4 + $0x1]  }
  0x45   :  { %115 = sst [smem:[#allocation13 + $0x3]] %s2046_s9  ;;  %s2054_s24 = smov [#allocation12]  }
  0x46   :  { %117 = sst [smem:[#allocation13 + $0x4]] %s2047_s11  ;;  %s2055_s25 = smov [#allocation2 + $0x200]  }
  0x47   :  { %119 = sst [smem:[#allocation13 + $0x5]] %s2045_s8  ;;  %s142_s26 = sshll.u32 %s2055_s25, 4  ;;  %s143_s26 = int_to_ptr.vmem [resolvable:$true] %s142_s26 }
  0x48   :  { %121 = sst [smem:[#allocation13 + $0x6]] %s2047_s11  ;;  %s128_s28 = scalar_lea.hbm %s2244_s3, 8192 }
  0x49   :  { %123 = sst [smem:[#allocation13 + $0x7]] %s2046_s9  ;;  %s2056_s29 = smov [#allocation4 + $0x2]  }
  0x4a   :  { %125 = sst [smem:[#allocation13 + $0x8]] %s2049_s14  ;;  %s2057_s30 = smov [#allocation14]  }
  0x4b   :  { %127 = dma.general %s91_s22, 4096, %s106_s19, %s2053_s23, %s2054_s24, [#allocation13], %s2137_s13, 0  }
  0x4c   :  { %146 = sst [smem:[#allocation15]] %s2044_s7  ;;  %s2058_s6 = smov [#allocation2 + $0x300]  }
  0x4d   :  { %148 = sst [smem:[#allocation15 + $0x1]] %s2044_s7  ;;  %s179_s2 = sshll.u32 %s2058_s6, 4  ;;  %s180_s2 = int_to_ptr.vmem [resolvable:$true] %s179_s2 }
  0x4e   :  { %150 = sst [smem:[#allocation15 + $0x2]] %s2045_s8  ;;  %s165_s15 = scalar_lea.hbm %s2244_s3, 12288 }
  0x4f   :  { %152 = sst [smem:[#allocation15 + $0x3]] %s2046_s9  ;;  %s2060_s16 = smov [#allocation16]  }
  0x50   :  { %154 = sst [smem:[#allocation15 + $0x4]] %s2047_s11  ;;  %s2061_s3 = smov [#allocation3]  }
  0x51   :  { %156 = sst [smem:[#allocation15 + $0x5]] %s2045_s8 }
  0x52   :  { %158 = sst [smem:[#allocation15 + $0x6]] %s2047_s11 }
  0x53   :  { %160 = sst [smem:[#allocation15 + $0x7]] %s2046_s9 }
  0x54   :  { %162 = sst [smem:[#allocation15 + $0x8]] %s2049_s14 }
  0x55   :  { %164 = dma.general %s128_s28, 4096, %s143_s26, %s2056_s29, %s2057_s30, [#allocation15], %s2137_s13, 0  }
  0x56   :  { %183 = sst [smem:[#allocation17]] %s2044_s7 }
  0x57   :  { %185 = sst [smem:[#allocation17 + $0x1]] %s2044_s7  ;;  %s2059_s7 = smov [#allocation4 + $0x3]  }
  0x58   :  { %187 = sst [smem:[#allocation17 + $0x2]] %s2045_s8 }
  0x59   :  { %189 = sst [smem:[#allocation17 + $0x3]] %s2046_s9 }
  0x5a   :  { %191 = sst [smem:[#allocation17 + $0x4]] %s2047_s11 }
  0x5b   :  { %193 = sst [smem:[#allocation17 + $0x5]] %s2045_s8  ;;  %s210_s8 = sshll.u32 %s2061_s3, 4  ;;  %s211_s8 = int_to_ptr.vmem [resolvable:$true] %s210_s8 }
  0x5c   :  { %195 = sst [smem:[#allocation17 + $0x6]] %s2047_s11 }
  0x5d   :  { %197 = sst [smem:[#allocation17 + $0x7]] %s2046_s9 }
  0x5e   :  { %199 = sst [smem:[#allocation17 + $0x8]] %s2049_s14 }
  0x5f   :  { %201 = dma.general %s165_s15, 4096, %s180_s2, %s2059_s7, %s2060_s16, [#allocation17], %s2137_s13, 0  }
  0x60   :  { %v1793_v0 = vld [vmem:[#allocation7 + $0x4] ss:$12 sps:$4 sm:$0xff]   ;;  %v1795_v1 = vld [vmem:[#allocation7] ss:$12 sps:$4 sm:$0xff]   ;;  %v1796_v2 = vld [vmem:[#allocation7 + $0x1c] ss:$12 sps:$4 sm:$0xff]  }
  0x61   :  { %873 = vmatprep.subr.bf16.mxu0 %v1793_v0  ;;  %v1798_v3 = vld [vmem:[#allocation7 + $0x18] ss:$12 sps:$4 sm:$0xff]   ;;  %v1799_v4 = vld [vmem:[#allocation7 + $0x34] ss:$12 sps:$4 sm:$0xff]   ;;  %v1801_v5 = vld [vmem:[#allocation7 + $0x30] ss:$12 sps:$4 sm:$0xff]  }
  0x62   :  { %874 = vmatpush1.bf16.msra.mxu0 %v1795_v1  ;;  %v1802_v6 = vld [vmem:[#allocation7 + $0x4c] ss:$12 sps:$4 sm:$0xff]   ;;  %v1804_v7 = vld [vmem:[#allocation7 + $0x48] ss:$12 sps:$4 sm:$0xff]   ;;  %v1805_v8 = vld [vmem:[#allocation7 + $0x64] ss:$12 sps:$4 sm:$0xff]  }
  0x63   :  { %875 = vmatprep.subr.bf16.mxu0 %v1796_v2  ;;  %v1820_v9 = vld [vmem:[#allocation7 + $0xc8] ss:$12 sps:$4 sm:$0xff]   ;;  %v1807_v11 = vld [vmem:[#allocation7 + $0x60] ss:$12 sps:$4 sm:$0xff]   ;;  %v1810_v15 = vld [vmem:[#allocation7 + $0x78] ss:$12 sps:$4 sm:$0xff]  }
  0x64   :  { %v1821_v10 = vld [vmem:[#allocation7 + $0x8] ss:$12 sps:$4 sm:$0xff]   ;;  %1665 = vmatprep.subr.bf16.mxu1 %v1820_v9  ;;  %v1825_v13 = vld [vmem:[#allocation7 + $0xe0] ss:$12 sps:$4 sm:$0xff]   ;;  %v1830_v17 = vld [vmem:[#allocation7 + $0xf8] ss:$12 sps:$4 sm:$0xff]  }
  0x65   :  { %v1808_v12 = vld [vmem:[#allocation7 + $0x7c] ss:$12 sps:$4 sm:$0xff]   ;;  %1666 = vmatpush3.bf16.msra.mxu1 %v1821_v10  ;;  %v1826_v14 = vld [vmem:[#allocation7 + $0x20] ss:$12 sps:$4 sm:$0xff]   ;;  %v1831_v18 = vld [vmem:[#allocation7 + $0x38] ss:$12 sps:$4 sm:$0xff]  }
  0x66   :  { %876 = vmatpush1.bf16.msra.mxu0 %v1798_v3  ;;  %v1811_v16 = vld [vmem:[#allocation7 + $0x94] ss:$12 sps:$4 sm:$0xff]   ;;  %1667 = vmatprep.subr.bf16.mxu1 %v1825_v13  ;;  %v1813_v19 = vld [vmem:[#allocation7 + $0x90] ss:$12 sps:$4 sm:$0xff]   ;;  %v1814_v22 = vld [vmem:[#allocation7 + $0xac] ss:$12 sps:$4 sm:$0xff]  }
  0x67   :  { %877 = vmatprep.subr.bf16.mxu0 %v1799_v4  ;;  %v1835_v20 = vld [vmem:[#allocation7 + $0x110] ss:$12 sps:$4 sm:$0xff]   ;;  %v1816_v23 = vld [vmem:[#allocation7 + $0xa8] ss:$12 sps:$4 sm:$0xff]   ;;  %v1845_v27 = vld [vmem:[#allocation7 + $0x140] ss:$12 sps:$4 sm:$0xff]  }
  0x68   :  { %v1836_v21 = vld [vmem:[#allocation7 + $0x50] ss:$12 sps:$4 sm:$0xff]   ;;  %v1840_v24 = vld [vmem:[#allocation7 + $0x128] ss:$12 sps:$4 sm:$0xff]   ;;  %v1819_v28 = vld [vmem:[#allocation7 + $0xc0] ss:$12 sps:$4 sm:$0xff]  }
  0x69   :  { %1668 = vmatpush3.bf16.msra.mxu1 %v1826_v14  ;;  %v1841_v25 = vld [vmem:[#allocation7 + $0x68] ss:$12 sps:$4 sm:$0xff]   ;;  %v1817_v26 = vld [vmem:[#allocation7 + $0xc4] ss:$12 sps:$4 sm:$0xff]   ;;  %v1846_v30 = vld [vmem:[#allocation7 + $0x80] ss:$12 sps:$4 sm:$0xff]  }
  0x6a   :  { %878 = vmatpush1.bf16.msra.mxu0 %v1801_v5  ;;  %1669 = vmatprep.subr.bf16.mxu1 %v1830_v17  ;;  %v1822_v29 = vld [vmem:[#allocation7 + $0xdc] ss:$12 sps:$4 sm:$0xff]   ;;  %v1850_v31 = vld [vmem:[#allocation7 + $0x158] ss:$12 sps:$4 sm:$0xff]   ;;  %v1827_v33 = vld [vmem:[#allocation7 + $0xf4] ss:$12 sps:$4 sm:$0xff]  }
  0x6b   :  { %879 = vmatprep.subr.bf16.mxu0 %v1802_v6  ;;  %v1824_v32 = vld [vmem:[#allocation7 + $0xd8] ss:$12 sps:$4 sm:$0xff]   ;;  %v1855_v35 = vld [vmem:[#allocation7 + $0x170] ss:$12 sps:$4 sm:$0xff]   ;;  %v1862_v41 = vld [vmem:[#allocation7 + $0x248] ss:$12 sps:$4 sm:$0xff]  }
  0x6c   :  { %v1851_v34 = vld [vmem:[#allocation7 + $0x98] ss:$12 sps:$4 sm:$0xff]   ;;  %v214_v36 = vld [vmem:[#allocation5] sm:$0xff]  ;;  %v1867_v46 = vld [vmem:[#allocation7 + $0x260] ss:$12 sps:$4 sm:$0xff]   ;;  %s2001_s13 = scalar_lea.hbm %s2245_s4, 3072 }
  0x6d   :  { %1670 = vmatpush3.bf16.msra.mxu1 %v1831_v18  ;;  %v1829_v37 = vld [vmem:[#allocation7 + $0xf0] ss:$12 sps:$4 sm:$0xff]   ;;  %v1832_v38 = vld [vmem:[#allocation7 + $0x10c] ss:$12 sps:$4 sm:$0xff]   ;;  %v1560_v39 = vcombine.high %v214_v36, %v214_v36  ;;  %v1834_v42 = vld [vmem:[#allocation7 + $0x108] ss:$12 sps:$4 sm:$0xff]   ;;  %v1559_v45 = vcombine.low %v214_v36, %v214_v36  ;;  %p2002_p10 = scmp.ne.s32.totalorder %s2245_s4, %s2001_s13  ;;  %p2005_p11 = scmp.lt.u32.totalorder %s2001_s13, %s2245_s4 }
  0x6e   :  { %880 = vmatpush1.bf16.msra.mxu0 %v1804_v7  ;;  %1671 = vmatprep.subr.bf16.mxu1 %v1835_v20  ;;  %v1856_v40 = vld [vmem:[#allocation7 + $0xb0] ss:$12 sps:$4 sm:$0xff]   ;;  %v1863_v44 = vld [vmem:[#allocation7 + $0x188] ss:$12 sps:$4 sm:$0xff]   ;;  %v1839_v47 = vld [vmem:[#allocation7 + $0x120] ss:$12 sps:$4 sm:$0xff]  }
  0x6f   :  { %881 = vmatprep.subr.bf16.mxu0 %v1805_v8  ;;  %905 = vmatprep.mubr.bf16.mxu0 %v1560_v39  ;;  %v1837_v43 = vld [vmem:[#allocation7 + $0x124] ss:$12 sps:$4 sm:$0xff]   ;;  %v1868_v48 = vld [vmem:[#allocation7 + $0x1a0] ss:$12 sps:$4 sm:$0xff]   ;;  %v1842_v49 = vld [vmem:[#allocation7 + $0x13c] ss:$12 sps:$4 sm:$0xff]   ;;  %p2007_p12 = pnand %p2005_p11, %p2002_p10 }
  0x70   :  { %987 = vmatprep.mubr.bf16.mxu1 %v1560_v39  ;;  %v1872_v50 = vld [vmem:[#allocation7 + $0x278] ss:$12 sps:$4 sm:$0xff]   ;;  %v1847_v52 = vld [vmem:[#allocation7 + $0x154] ss:$12 sps:$4 sm:$0xff]   ;;  %v1877_v54 = vld [vmem:[#allocation7 + $0x290] ss:$12 sps:$4 sm:$0xff]  }
  0x71   :  { %1672 = vmatpush3.bf16.msra.mxu1 %v1836_v21  ;;  %v1844_v51 = vld [vmem:[#allocation7 + $0x138] ss:$12 sps:$4 sm:$0xff]   ;;  %v1849_v55 = vld [vmem:[#allocation7 + $0x150] ss:$12 sps:$4 sm:$0xff]   ;;  %v1882_v58 = vld [vmem:[#allocation7 + $0x2a8] ss:$12 sps:$4 sm:$0xff]  }
  0x72   :  { %882 = vmatpush1.bf16.msra.mxu0 %v1807_v11  ;;  %1673 = vmatprep.subr.bf16.mxu1 %v1840_v24  ;;  %v1873_v53 = vld [vmem:[#allocation7 + $0x1b8] ss:$12 sps:$4 sm:$0xff]   ;;  %v1878_v57 = vld [vmem:[#allocation7 + $0x1d0] ss:$12 sps:$4 sm:$0xff]   ;;  %v1854_v59 = vld [vmem:[#allocation7 + $0x168] ss:$12 sps:$4 sm:$0xff]  }
  0x73   :  { %883 = vmatprep.subr.bf16.mxu0 %v1808_v12  ;;  %v1852_v56 = vld [vmem:[#allocation7 + $0x16c] ss:$12 sps:$4 sm:$0xff]   ;;  %v1861_v60 = vld [vmem:[#allocation7 + $0x184] ss:$12 sps:$4 sm:$0xff]   ;;  %v1883_v61 = vld [vmem:[#allocation7 + $0x1e8] ss:$12 sps:$4 sm:$0xff]  }
  0x74   :  { %v1887_v62 = vld [vmem:[#allocation7 + $0x2c0] ss:$12 sps:$4 sm:$0xff]   ;;  %v1866_v0 = vld [vmem:[#allocation7 + $0x19c] ss:$12 sps:$4 sm:$0xff]   ;;  %v1892_v2 = vld [vmem:[#allocation7 + $0x2d8] ss:$12 sps:$4 sm:$0xff]  }
  0x75   :  { %1674 = vmatpush3.bf16.msra.mxu1 %v1841_v25  ;;  %v1859_v63 = vld [vmem:[#allocation7 + $0x180] ss:$12 sps:$4 sm:$0xff]   ;;  %v215_v3 = vld [vmem:[#allocation5 + $0x8] sm:$0xff]  ;;  %v1874_v13 = vld [vmem:[#allocation7 + $0x1c8] ss:$12 sps:$4 sm:$0xff]  }
  0x76   :  { %884 = vmatpush1.bf16.msra.mxu0 %v1810_v15  ;;  %1675 = vmatprep.subr.bf16.mxu1 %v1845_v27  ;;  %v1888_v1 = vld [vmem:[#allocation7 + $0x200] ss:$12 sps:$4 sm:$0xff]   ;;  %v1864_v4 = vld [vmem:[#allocation7 + $0x198] ss:$12 sps:$4 sm:$0xff]   ;;  %v1562_v5 = vcombine.high %v215_v3, %v215_v3  ;;  %v1897_v8 = vld [vmem:[#allocation7 + $0x2f0] ss:$12 sps:$4 sm:$0xff]   ;;  %v1561_v12 = vcombine.low %v215_v3, %v215_v3 }
  0x77   :  { %885 = vmatprep.subr.bf16.mxu0 %v1811_v16  ;;  %v1893_v6 = vld [vmem:[#allocation7 + $0x218] ss:$12 sps:$4 sm:$0xff]   ;;  %v1871_v7 = vld [vmem:[#allocation7 + $0x1b4] ss:$12 sps:$4 sm:$0xff]   ;;  %v1869_v9 = vld [vmem:[#allocation7 + $0x1b0] ss:$12 sps:$4 sm:$0xff]  }
  0x78   :  { %v1898_v10 = vld [vmem:[#allocation7 + $0x230] ss:$12 sps:$4 sm:$0xff]   ;;  %v1876_v11 = vld [vmem:[#allocation7 + $0x1cc] ss:$12 sps:$4 sm:$0xff]   ;;  %v1891_v18 = vld [vmem:[#allocation7 + $0x214] ss:$12 sps:$4 sm:$0xff]  }
  0x79   :  { %1676 = vmatpush3.bf16.msra.mxu1 %v1846_v30  ;;  %v1881_v14 = vld [vmem:[#allocation7 + $0x1e4] ss:$12 sps:$4 sm:$0xff]   ;;  %v1879_v15 = vld [vmem:[#allocation7 + $0x1e0] ss:$12 sps:$4 sm:$0xff]   ;;  %v1886_v16 = vld [vmem:[#allocation7 + $0x1fc] ss:$12 sps:$4 sm:$0xff]  }
  0x7a   :  { %886 = vmatpush1.bf16.msra.mxu0 %v1813_v19  ;;  %1677 = vmatprep.subr.bf16.mxu1 %v1850_v31  ;;  %v1884_v17 = vld [vmem:[#allocation7 + $0x1f8] ss:$12 sps:$4 sm:$0xff]   ;;  %v1889_v19 = vld [vmem:[#allocation7 + $0x210] ss:$12 sps:$4 sm:$0xff]   ;;  %v1894_v21 = vld [vmem:[#allocation7 + $0x228] ss:$12 sps:$4 sm:$0xff]  }
  0x7b   :  { %887 = vmatprep.subr.bf16.mxu0 %v1814_v22  ;;  %v1896_v20 = vld [vmem:[#allocation7 + $0x22c] ss:$12 sps:$4 sm:$0xff]   ;;  %v1901_v22 = vld [vmem:[#allocation7 + $0x244] ss:$12 sps:$4 sm:$0xff]   ;;  %v1906_v24 = vld [vmem:[#allocation7 + $0x25c] ss:$12 sps:$4 sm:$0xff]  }
  0x7c   :  { %v1904_v25 = vld [vmem:[#allocation7 + $0x258] ss:$12 sps:$4 sm:$0xff]   ;;  %v1907_v27 = vld [vmem:[#allocation7 + $0x270] ss:$12 sps:$4 sm:$0xff]   ;;  %v1913_v31 = vld [vmem:[#allocation7 + $0x2a0] ss:$12 sps:$4 sm:$0xff]  }
  0x7d   :  { %1678 = vmatpush3.bf16.msra.mxu1 %v1851_v34  ;;  %v1915_v30 = vld [vmem:[#allocation7 + $0x2a4] ss:$12 sps:$4 sm:$0xff]   ;;  %v1921_v34 = vld [vmem:[#allocation7 + $0x2d4] ss:$12 sps:$4 sm:$0xff]   ;;  %v1924_v36 = vld [vmem:[#allocation7 + $0x2ec] ss:$12 sps:$4 sm:$0xff]  }
  0x7e   :  { %888 = vmatpush1.bf16.msra.mxu0 %v1816_v23  ;;  %1679 = vmatprep.subr.bf16.mxu1 %v1855_v35  ;;  %v1899_v23 = vld [vmem:[#allocation7 + $0x240] ss:$12 sps:$4 sm:$0xff]   ;;  %v1919_v35 = vld [vmem:[#allocation7 + $0x2d0] ss:$12 sps:$4 sm:$0xff]  }
  0x7f   :  { %889 = vmatprep.subr.bf16.mxu0 %v1817_v26  ;;  %v1909_v26 = vld [vmem:[#allocation7 + $0x274] ss:$12 sps:$4 sm:$0xff]  }
  0x81   :  { %1680 = vmatpush3.bf16.msra.mxu1 %v1856_v40 }
  0x82   :  { %890 = vmatpush1.bf16.msra.mxu0 %v1819_v28  ;;  %1687 = vmatprep.subr.bf16.mxu1 %v1862_v41  ;;  %v1912_v28 = vld [vmem:[#allocation7 + $0x28c] ss:$12 sps:$4 sm:$0xff]  }
  0x83   :  { %891 = vmatprep.subr.bf16.mxu0 %v1822_v29  ;;  %v1910_v29 = vld [vmem:[#allocation7 + $0x288] ss:$12 sps:$4 sm:$0xff]  }
  0x84   :  { %988 = vmatmul.mubr.bf16.vlgmr.msra.gmra.mrb[0].mxu1 %v1559_v45 }
  0x85   :  { %1688 = vmatpush3.bf16.msra.mxu1 %v1863_v44  ;;  %1027 = vmatprep.mubr.bf16.mxu1 %v1562_v5 }
  0x86   :  { %892 = vmatpush1.bf16.msra.mxu0 %v1824_v32  ;;  %1689 = vmatprep.subr.bf16.mxu1 %v1867_v46  ;;  %v1918_v32 = vld [vmem:[#allocation7 + $0x2bc] ss:$12 sps:$4 sm:$0xff]  }
  0x87   :  { %893 = vmatprep.subr.bf16.mxu0 %v1827_v33  ;;  %v1916_v33 = vld [vmem:[#allocation7 + $0x2b8] ss:$12 sps:$4 sm:$0xff]  }
  0x89   :  { %1690 = vmatpush3.bf16.msra.mxu1 %v1868_v48 }
  0x8a   :  { %894 = vmatpush1.bf16.msra.mxu0 %v1829_v37  ;;  %1691 = vmatprep.subr.bf16.mxu1 %v1872_v50  ;;  %v1922_v37 = vld [vmem:[#allocation7 + $0x2e8] ss:$12 sps:$4 sm:$0xff]  }
  0x8b   :  { %895 = vmatprep.subr.bf16.mxu0 %v1832_v38 }
  0x8d   :  { %1692 = vmatpush3.bf16.msra.mxu1 %v1873_v53 }
  0x8e   :  { %896 = vmatpush1.bf16.msra.mxu0 %v1834_v42  ;;  %1693 = vmatprep.subr.bf16.mxu1 %v1877_v54 }
  0x8f   :  { %897 = vmatprep.subr.bf16.mxu0 %v1837_v43 }
  0x91   :  { %1694 = vmatpush3.bf16.msra.mxu1 %v1878_v57 }
  0x92   :  { %898 = vmatpush1.bf16.msra.mxu0 %v1839_v47  ;;  %1695 = vmatprep.subr.bf16.mxu1 %v1882_v58 }
  0x93   :  { %899 = vmatprep.subr.bf16.mxu0 %v1842_v49 }
  0x95   :  { %1696 = vmatpush3.bf16.msra.mxu1 %v1883_v61 }
  0x96   :  { %900 = vmatpush1.bf16.msra.mxu0 %v1844_v51  ;;  %1697 = vmatprep.subr.bf16.mxu1 %v1887_v62 }
  0x97   :  { %901 = vmatprep.subr.bf16.mxu0 %v1847_v52 }
  0x99   :  { %1698 = vmatpush3.bf16.msra.mxu1 %v1888_v1 }
  0x9a   :  { %902 = vmatpush1.bf16.msra.mxu0 %v1849_v55  ;;  %1699 = vmatprep.subr.bf16.mxu1 %v1892_v2 }
  0x9b   :  { %903 = vmatprep.subr.bf16.mxu0 %v1852_v56 }
  0x9d   :  { %1700 = vmatpush3.bf16.msra.mxu1 %v1893_v6 }
  0x9e   :  { %904 = vmatpush1.bf16.msra.mxu0 %v1854_v59  ;;  %1701 = vmatprep.subr.bf16.mxu1 %v1897_v8 }
  0x9f   :  { %914 = vmatprep.subr.bf16.mxu0 %v1861_v60 }
  0xa1   :  { %906 = vmatmul.mubr.bf16.vlgmr.msra.gmra.mrb[0].mxu0 %v1559_v45  ;;  %1702 = vmatpush3.bf16.msra.mxu1 %v1898_v10 }
  0xa2   :  { %915 = vmatpush1.bf16.msra.mxu0 %v1859_v63  ;;  %946 = vmatprep.mubr.bf16.mxu0 %v1562_v5 }
  0xa3   :  { %916 = vmatprep.subr.bf16.mxu0 %v1866_v0 }
  0xa4   :  { %1028 = vmatmul.mubr.bf16.vlgmr.msra.gmra.mrb[4].mxu1 %v1561_v12 }
  0xa6   :  { %917 = vmatpush1.bf16.msra.mxu0 %v1864_v4 }
  0xa7   :  { %918 = vmatprep.subr.bf16.mxu0 %v1871_v7 }
  0xaa   :  { %919 = vmatpush1.bf16.msra.mxu0 %v1869_v9 }
  0xab   :  { %920 = vmatprep.subr.bf16.mxu0 %v1876_v11 }
  0xae   :  { %921 = vmatpush1.bf16.msra.mxu0 %v1874_v13 }
  0xaf   :  { %922 = vmatprep.subr.bf16.mxu0 %v1881_v14 }
  0xb2   :  { %923 = vmatpush1.bf16.msra.mxu0 %v1879_v15 }
  0xb3   :  { %924 = vmatprep.subr.bf16.mxu0 %v1886_v16 }
  0xb6   :  { %925 = vmatpush1.bf16.msra.mxu0 %v1884_v17 }
  0xb7   :  { %926 = vmatprep.subr.bf16.mxu0 %v1891_v18 }
  0xba   :  { %927 = vmatpush1.bf16.msra.mxu0 %v1889_v19 }
  0xbb   :  { %928 = vmatprep.subr.bf16.mxu0 %v1896_v20 }
  0xbe   :  { %929 = vmatpush1.bf16.msra.mxu0 %v1894_v21 }
  0xbf   :  { %930 = vmatprep.subr.bf16.mxu0 %v1901_v22 }
  0xc2   :  { %931 = vmatpush1.bf16.msra.mxu0 %v1899_v23 }
  0xc3   :  { %932 = vmatprep.subr.bf16.mxu0 %v1906_v24 }
  0xc6   :  { %933 = vmatpush1.bf16.msra.mxu0 %v1904_v25 }
  0xc7   :  { %934 = vmatprep.subr.bf16.mxu0 %v1909_v26 }
  0xca   :  { %935 = vmatpush1.bf16.msra.mxu0 %v1907_v27 }
  0xcb   :  { %936 = vmatprep.subr.bf16.mxu0 %v1912_v28 }
  0xce   :  { %937 = vmatpush1.bf16.msra.mxu0 %v1910_v29 }
  0xcf   :  { %938 = vmatprep.subr.bf16.mxu0 %v1915_v30 }
  0xd2   :  { %939 = vmatpush1.bf16.msra.mxu0 %v1913_v31 }
  0xd3   :  { %940 = vmatprep.subr.bf16.mxu0 %v1918_v32 }
  0xd6   :  { %941 = vmatpush1.bf16.msra.mxu0 %v1916_v33 }
  0xd7   :  { %942 = vmatprep.subr.bf16.mxu0 %v1921_v34 }
  0xda   :  { %943 = vmatpush1.bf16.msra.mxu0 %v1919_v35 }
  0xdb   :  { %944 = vmatprep.subr.bf16.mxu0 %v1924_v36 }
  0xde   :  { %945 = vmatpush1.bf16.msra.mxu0 %v1922_v37 }
  0xe1   :  { %947 = vmatmul.mubr.bf16.vlgmr.msra.gmra.mrb[0].mxu0 %v1561_v12 }
  0xe2   :  { %2010 = shalt.err (!%p2007_p12)  }
  0xe3   :  { %s2011_s19 = scalar_lea.vmem %s211_s8, 3072  ;;  %p2016_p0 = scmp.lt.s32.totalorder %s211_s8, %s211_s8 }
  0xe4   :  { %p2012_p13 = scmp.ne.s32.totalorder %s211_s8, %s2011_s19  ;;  %p2017_p1 = scmp.lt.s32.totalorder %s2011_s19, %s2011_s19 }
  0xe6   :  { %p2018_p2 = por %p2017_p1, %p2016_p0 }
  0xe8   :  { %p2019_p3 = pnand %p2018_p2, %p2012_p13 }
  0xea   :  { %2022 = shalt.err (!%p2019_p3)  }
  0xeb   :  { %213 = dma.hbm_to_vmem [thread:$0]  %s2245_s4, 3072, %s211_s8, [#allocation4 + $0x4]  ;;  %v346_v43 = vld [vmem:[#allocation9 + $0x10] sm:$0xff]  ;;  %v344_v51 = vld [vmem:[#allocation9] sm:$0xff]  ;;  %v345_v52 = vld [vmem:[#allocation9 + $0x8] sm:$0xff] }
 0x157   :  { %v1681_v38 = vpop.f32.mrb[0].mxu1 }
 0x158   :  { %v1682_v39 = vpop.f32.mrb[1].mxu1 }
 0x159   :  { %v1683_v40 = vadd.f32 %v1682_v39, %v1681_v38  ;;  %v1684_v41 = vpop.f32.mrb[2].mxu1 }
 0x15a   :  { %v1685_v42 = vpop.f32.mrb[3].mxu1 }
 0x15b   :  { %v990_v44 = vadd.f32 %v1683_v40, %v346_v43 }
 0x177   :  { %v1703_v45 = vpop.f32.mrb[4].mxu1 }
 0x178   :  { %v1704_v46 = vpop.f32.mrb[5].mxu1 }
 0x179   :  { %v1705_v47 = vadd.f32 %v1704_v46, %v1703_v45  ;;  %v1706_v48 = vpop.f32.mrb[6].mxu1 }
 0x17a   :  { %v1707_v49 = vpop.f32.mrb[7].mxu1 }
 0x17b   :  { %v2196_v50 = vadd.f32 %v1705_v47, %v990_v44 }
 0x1b4   :  { %v948_v53 = vpop.f32.mrb[0].mxu0 }
 0x1b5   :  { %v2198_v54 = vadd.f32 %v948_v53, %v344_v51  ;;  %v950_v55 = vpop.f32.mrb[1].mxu0 }
 0x1b6   :  { %v1761_v56 = vadd.f32 %v950_v55, %v345_v52  ;;  %v952_v57 = vpop.f32.mrb[2].mxu0 }
 0x1b7   :  { %v1035_v58 = vmax.f32 %v2198_v54, 0.0  ;;  %v953_v59 = vpop.f32.mrb[3].mxu0 }
 0x1b8   :  { %v1036_v60 = vmax.f32 %v1761_v56, 0.0 }
 0x1b9   :  { %2027 = dma.done.wait [#allocation4], 4096 }
 0x1ba   :  { %2028 = vsyncadd [#allocation4], 4294963200  ;;  %v1045_v61 = vpack.c.bf16 %v1036_v60, %v1036_v60  ;;  %v1047_v62 = vld [vmem:[#allocation2 + $0x8] sm:$0xff]  ;;  %v1046_v63 = vld [vmem:[#allocation2] sm:$0xff]  ;;  %v1044_v30 = vpack.c.bf16 %v1035_v58, %v1035_v58 }
 0x1bb   :  { %v1049_v0 = vld [vmem:[#allocation2 + $0x18] sm:$0xff]  ;;  %1078 = vmatprep.subr.bf16.mxu1 %v1047_v62  ;;  %v1048_v1 = vld [vmem:[#allocation2 + $0x10] sm:$0xff]  ;;  %v1051_v2 = vld [vmem:[#allocation2 + $0x28] sm:$0xff] }
 0x1bc   :  { %1110 = vmatprep.mubr.bf16.mxu1 %v1045_v61  ;;  %1079 = vmatpush1.bf16.msra.mxu1 %v1046_v63  ;;  %v1050_v3 = vld [vmem:[#allocation2 + $0x20] sm:$0xff]  ;;  %v1053_v4 = vld [vmem:[#allocation2 + $0x38] sm:$0xff]  ;;  %v1052_v5 = vld [vmem:[#allocation2 + $0x30] sm:$0xff] }
 0x1bd   :  { %1080 = vmatprep.subr.bf16.mxu1 %v1049_v0  ;;  %v1055_v6 = vld [vmem:[#allocation2 + $0x48] sm:$0xff]  ;;  %v1054_v7 = vld [vmem:[#allocation2 + $0x40] sm:$0xff]  ;;  %v1057_v8 = vld [vmem:[#allocation2 + $0x58] sm:$0xff] }
 0x1be   :  { %v1056_v9 = vld [vmem:[#allocation2 + $0x50] sm:$0xff]  ;;  %v1059_v10 = vld [vmem:[#allocation2 + $0x68] sm:$0xff]  ;;  %v1058_v11 = vld [vmem:[#allocation2 + $0x60] sm:$0xff] }
 0x1bf   :  { %v1061_v12 = vld [vmem:[#allocation2 + $0x78] sm:$0xff]  ;;  %v1060_v13 = vld [vmem:[#allocation2 + $0x70] sm:$0xff]  ;;  %v1063_v14 = vld [vmem:[#allocation2 + $0x88] sm:$0xff] }
 0x1c0   :  { %1081 = vmatpush1.bf16.msra.mxu1 %v1048_v1  ;;  %v1062_v15 = vld [vmem:[#allocation2 + $0x80] sm:$0xff]  ;;  %v1065_v16 = vld [vmem:[#allocation2 + $0x98] sm:$0xff]  ;;  %v1064_v17 = vld [vmem:[#allocation2 + $0x90] sm:$0xff] }
 0x1c1   :  { %1082 = vmatprep.subr.bf16.mxu1 %v1051_v2  ;;  %v1067_v18 = vld [vmem:[#allocation2 + $0xa8] sm:$0xff]  ;;  %v1066_v19 = vld [vmem:[#allocation2 + $0xa0] sm:$0xff]  ;;  %v1069_v20 = vld [vmem:[#allocation2 + $0xb8] sm:$0xff] }
 0x1c2   :  { %v1068_v21 = vld [vmem:[#allocation2 + $0xb0] sm:$0xff]  ;;  %v1071_v22 = vld [vmem:[#allocation2 + $0xc8] sm:$0xff]  ;;  %v1070_v23 = vld [vmem:[#allocation2 + $0xc0] sm:$0xff] }
 0x1c3   :  { %v1073_v24 = vld [vmem:[#allocation2 + $0xd8] sm:$0xff]  ;;  %v1072_v25 = vld [vmem:[#allocation2 + $0xd0] sm:$0xff]  ;;  %v1075_v26 = vld [vmem:[#allocation2 + $0xe8] sm:$0xff] }
 0x1c4   :  { %1083 = vmatpush1.bf16.msra.mxu1 %v1050_v3  ;;  %v1074_v27 = vld [vmem:[#allocation2 + $0xe0] sm:$0xff]  ;;  %v1077_v28 = vld [vmem:[#allocation2 + $0xf8] sm:$0xff]  ;;  %v1076_v29 = vld [vmem:[#allocation2 + $0xf0] sm:$0xff] }
 0x1c5   :  { %1084 = vmatprep.subr.bf16.mxu1 %v1053_v4  ;;  %v1042_v31 = vld [vmem:[#allocation9 + $0x18] sm:$0xff]  ;;  %v1043_v32 = vld [vmem:[#allocation9 + $0x20] sm:$0xff] }
 0x1c8   :  { %1085 = vmatpush1.bf16.msra.mxu1 %v1052_v5 }
 0x1c9   :  { %1086 = vmatprep.subr.bf16.mxu1 %v1055_v6 }
 0x1cc   :  { %1087 = vmatpush1.bf16.msra.mxu1 %v1054_v7 }
 0x1cd   :  { %1088 = vmatprep.subr.bf16.mxu1 %v1057_v8 }
 0x1d0   :  { %1089 = vmatpush1.bf16.msra.mxu1 %v1056_v9 }
 0x1d1   :  { %1090 = vmatprep.subr.bf16.mxu1 %v1059_v10 }
 0x1d4   :  { %1091 = vmatpush1.bf16.msra.mxu1 %v1058_v11 }
 0x1d5   :  { %1092 = vmatprep.subr.bf16.mxu1 %v1061_v12 }
 0x1d8   :  { %1093 = vmatpush1.bf16.msra.mxu1 %v1060_v13 }
 0x1d9   :  { %1094 = vmatprep.subr.bf16.mxu1 %v1063_v14 }
 0x1dc   :  { %1095 = vmatpush1.bf16.msra.mxu1 %v1062_v15 }
 0x1dd   :  { %1096 = vmatprep.subr.bf16.mxu1 %v1065_v16 }
 0x1e0   :  { %1097 = vmatpush1.bf16.msra.mxu1 %v1064_v17 }
 0x1e1   :  { %1098 = vmatprep.subr.bf16.mxu1 %v1067_v18 }
 0x1e4   :  { %1099 = vmatpush1.bf16.msra.mxu1 %v1066_v19 }
 0x1e5   :  { %1100 = vmatprep.subr.bf16.mxu1 %v1069_v20 }
 0x1e8   :  { %1101 = vmatpush1.bf16.msra.mxu1 %v1068_v21 }
 0x1e9   :  { %1102 = vmatprep.subr.bf16.mxu1 %v1071_v22 }
 0x1ec   :  { %1103 = vmatpush1.bf16.msra.mxu1 %v1070_v23 }
 0x1ed   :  { %1104 = vmatprep.subr.bf16.mxu1 %v1073_v24 }
 0x1f0   :  { %1105 = vmatpush1.bf16.msra.mxu1 %v1072_v25 }
 0x1f1   :  { %1106 = vmatprep.subr.bf16.mxu1 %v1075_v26 }
 0x1f4   :  { %1107 = vmatpush1.bf16.msra.mxu1 %v1074_v27 }
 0x1f5   :  { %1108 = vmatprep.subr.bf16.mxu1 %v1077_v28 }
 0x1f8   :  { %1109 = vmatpush1.bf16.msra.mxu1 %v1076_v29 }
 0x1fb   :  { %1111 = vmatmul.mubr.bf16.vlgmr.msra.gmra.mrb[8].mxu1 %v1044_v30 }
 0x2ce   :  { %v1112_v33 = vpop.f32.mrb[8].mxu1 }
 0x2cf   :  { %v2204_v34 = vadd.f32 %v1112_v33, %v1042_v31  ;;  %v1114_v35 = vpop.f32.mrb[9].mxu1 }
 0x2d0   :  { %v1115_v36 = vadd.f32 %v1114_v35, %v1043_v32  ;;  %v1116_v37 = vpop.f32.mrb[10].mxu1 }
 0x2d1   :  { %v1119_v38 = vmax.f32 %v2204_v34, 0.0  ;;  %v1117_v39 = vpop.f32.mrb[11].mxu1 }
 0x2d2   :  { %v1120_v40 = vmax.f32 %v1115_v36, 0.0 }
 0x2d3   :  { %2029 = dma.done.wait [#allocation4 + $0x1], 4096 }
 0x2d4   :  { %2030 = vsyncadd [#allocation4 + $0x1], 4294963200  ;;  %v1127_v41 = vpack.c.bf16 %v1120_v40, %v1120_v40  ;;  %v1129_v42 = vld [vmem:[#allocation2 + $0x108] sm:$0xff]  ;;  %v1128_v43 = vld [vmem:[#allocation2 + $0x100] sm:$0xff]  ;;  %v1126_v11 = vpack.c.bf16 %v1119_v38, %v1119_v38 }
 0x2d5   :  { %v1131_v44 = vld [vmem:[#allocation2 + $0x118] sm:$0xff]  ;;  %1160 = vmatprep.subr.bf16.mxu0 %v1129_v42  ;;  %v1130_v45 = vld [vmem:[#allocation2 + $0x110] sm:$0xff]  ;;  %v1133_v46 = vld [vmem:[#allocation2 + $0x128] sm:$0xff] }
 0x2d6   :  { %1192 = vmatprep.mubr.bf16.mxu0 %v1127_v41  ;;  %1161 = vmatpush1.bf16.msra.mxu0 %v1128_v43  ;;  %v1132_v47 = vld [vmem:[#allocation2 + $0x120] sm:$0xff]  ;;  %v1135_v48 = vld [vmem:[#allocation2 + $0x138] sm:$0xff]  ;;  %v1134_v49 = vld [vmem:[#allocation2 + $0x130] sm:$0xff] }
 0x2d7   :  { %1162 = vmatprep.subr.bf16.mxu0 %v1131_v44  ;;  %v1137_v51 = vld [vmem:[#allocation2 + $0x148] sm:$0xff]  ;;  %v1136_v52 = vld [vmem:[#allocation2 + $0x140] sm:$0xff]  ;;  %v1139_v53 = vld [vmem:[#allocation2 + $0x158] sm:$0xff] }
 0x2d8   :  { %v1138_v54 = vld [vmem:[#allocation2 + $0x150] sm:$0xff]  ;;  %v1141_v55 = vld [vmem:[#allocation2 + $0x168] sm:$0xff]  ;;  %v1140_v56 = vld [vmem:[#allocation2 + $0x160] sm:$0xff] }
 0x2d9   :  { %v1143_v57 = vld [vmem:[#allocation2 + $0x178] sm:$0xff]  ;;  %v1142_v58 = vld [vmem:[#allocation2 + $0x170] sm:$0xff]  ;;  %v1145_v59 = vld [vmem:[#allocation2 + $0x188] sm:$0xff] }
 0x2da   :  { %1163 = vmatpush1.bf16.msra.mxu0 %v1130_v45  ;;  %v1144_v60 = vld [vmem:[#allocation2 + $0x180] sm:$0xff]  ;;  %v1147_v61 = vld [vmem:[#allocation2 + $0x198] sm:$0xff]  ;;  %v1146_v62 = vld [vmem:[#allocation2 + $0x190] sm:$0xff] }
 0x2db   :  { %1164 = vmatprep.subr.bf16.mxu0 %v1133_v46  ;;  %v1149_v63 = vld [vmem:[#allocation2 + $0x1a8] sm:$0xff]  ;;  %v1148_v0 = vld [vmem:[#allocation2 + $0x1a0] sm:$0xff]  ;;  %v1151_v1 = vld [vmem:[#allocation2 + $0x1b8] sm:$0xff] }
 0x2dc   :  { %v1150_v2 = vld [vmem:[#allocation2 + $0x1b0] sm:$0xff]  ;;  %v1153_v3 = vld [vmem:[#allocation2 + $0x1c8] sm:$0xff]  ;;  %v1152_v4 = vld [vmem:[#allocation2 + $0x1c0] sm:$0xff] }
 0x2dd   :  { %v1155_v5 = vld [vmem:[#allocation2 + $0x1d8] sm:$0xff]  ;;  %v1154_v6 = vld [vmem:[#allocation2 + $0x1d0] sm:$0xff]  ;;  %v1157_v7 = vld [vmem:[#allocation2 + $0x1e8] sm:$0xff] }
 0x2de   :  { %1165 = vmatpush1.bf16.msra.mxu0 %v1132_v47  ;;  %v1156_v8 = vld [vmem:[#allocation2 + $0x1e0] sm:$0xff]  ;;  %v1159_v9 = vld [vmem:[#allocation2 + $0x1f8] sm:$0xff]  ;;  %v1158_v10 = vld [vmem:[#allocation2 + $0x1f0] sm:$0xff] }
 0x2df   :  { %1166 = vmatprep.subr.bf16.mxu0 %v1135_v48  ;;  %v1124_v12 = vld [vmem:[#allocation9 + $0x30] sm:$0xff]  ;;  %v1125_v13 = vld [vmem:[#allocation9 + $0x38] sm:$0xff] }
 0x2e2   :  { %1167 = vmatpush1.bf16.msra.mxu0 %v1134_v49 }
 0x2e3   :  { %1168 = vmatprep.subr.bf16.mxu0 %v1137_v51 }
 0x2e6   :  { %1169 = vmatpush1.bf16.msra.mxu0 %v1136_v52 }
 0x2e7   :  { %1170 = vmatprep.subr.bf16.mxu0 %v1139_v53 }
 0x2ea   :  { %1171 = vmatpush1.bf16.msra.mxu0 %v1138_v54 }
 0x2eb   :  { %1172 = vmatprep.subr.bf16.mxu0 %v1141_v55 }
 0x2ee   :  { %1173 = vmatpush1.bf16.msra.mxu0 %v1140_v56 }
 0x2ef   :  { %1174 = vmatprep.subr.bf16.mxu0 %v1143_v57 }
 0x2f2   :  { %1175 = vmatpush1.bf16.msra.mxu0 %v1142_v58 }
 0x2f3   :  { %1176 = vmatprep.subr.bf16.mxu0 %v1145_v59 }
 0x2f6   :  { %1177 = vmatpush1.bf16.msra.mxu0 %v1144_v60 }
 0x2f7   :  { %1178 = vmatprep.subr.bf16.mxu0 %v1147_v61 }
 0x2fa   :  { %1179 = vmatpush1.bf16.msra.mxu0 %v1146_v62 }
 0x2fb   :  { %1180 = vmatprep.subr.bf16.mxu0 %v1149_v63 }
 0x2fe   :  { %1181 = vmatpush1.bf16.msra.mxu0 %v1148_v0 }
 0x2ff   :  { %1182 = vmatprep.subr.bf16.mxu0 %v1151_v1 }
 0x302   :  { %1183 = vmatpush1.bf16.msra.mxu0 %v1150_v2 }
 0x303   :  { %1184 = vmatprep.subr.bf16.mxu0 %v1153_v3 }
 0x306   :  { %1185 = vmatpush1.bf16.msra.mxu0 %v1152_v4 }
 0x307   :  { %1186 = vmatprep.subr.bf16.mxu0 %v1155_v5 }
 0x30a   :  { %1187 = vmatpush1.bf16.msra.mxu0 %v1154_v6 }
 0x30b   :  { %1188 = vmatprep.subr.bf16.mxu0 %v1157_v7 }
 0x30e   :  { %1189 = vmatpush1.bf16.msra.mxu0 %v1156_v8 }
 0x30f   :  { %1190 = vmatprep.subr.bf16.mxu0 %v1159_v9 }
 0x312   :  { %1191 = vmatpush1.bf16.msra.mxu0 %v1158_v10 }
 0x315   :  { %1193 = vmatmul.mubr.bf16.vlgmr.msra.gmra.mrb[4].mxu0 %v1126_v11 }
 0x3e8   :  { %v1194_v14 = vpop.f32.mrb[4].mxu0 }
 0x3e9   :  { %v2210_v15 = vadd.f32 %v1194_v14, %v1124_v12  ;;  %v1196_v16 = vpop.f32.mrb[5].mxu0 }
 0x3ea   :  { %v1197_v17 = vadd.f32 %v1196_v16, %v1125_v13  ;;  %v1198_v18 = vpop.f32.mrb[6].mxu0 }
 0x3eb   :  { %v1201_v19 = vmax.f32 %v2210_v15, 0.0  ;;  %v1199_v20 = vpop.f32.mrb[7].mxu0 }
 0x3ec   :  { %v1202_v21 = vmax.f32 %v1197_v17, 0.0 }
 0x3ed   :  { %2031 = dma.done.wait [#allocation4 + $0x2], 4096 }
 0x3ee   :  { %2032 = vsyncadd [#allocation4 + $0x2], 4294963200  ;;  %v1209_v22 = vpack.c.bf16 %v1202_v21, %v1202_v21  ;;  %v1211_v23 = vld [vmem:[#allocation2 + $0x208] sm:$0xff]  ;;  %v1210_v24 = vld [vmem:[#allocation2 + $0x200] sm:$0xff]  ;;  %v1208_v56 = vpack.c.bf16 %v1201_v19, %v1201_v19 }
 0x3ef   :  { %v1213_v25 = vld [vmem:[#allocation2 + $0x218] sm:$0xff]  ;;  %1242 = vmatprep.subr.bf16.mxu1 %v1211_v23  ;;  %v1212_v26 = vld [vmem:[#allocation2 + $0x210] sm:$0xff]  ;;  %v1215_v27 = vld [vmem:[#allocation2 + $0x228] sm:$0xff] }
 0x3f0   :  { %1274 = vmatprep.mubr.bf16.mxu1 %v1209_v22  ;;  %1243 = vmatpush1.bf16.msra.mxu1 %v1210_v24  ;;  %v1214_v28 = vld [vmem:[#allocation2 + $0x220] sm:$0xff]  ;;  %v1217_v29 = vld [vmem:[#allocation2 + $0x238] sm:$0xff]  ;;  %v1216_v30 = vld [vmem:[#allocation2 + $0x230] sm:$0xff] }
 0x3f1   :  { %1244 = vmatprep.subr.bf16.mxu1 %v1213_v25  ;;  %v1219_v31 = vld [vmem:[#allocation2 + $0x248] sm:$0xff]  ;;  %v1218_v32 = vld [vmem:[#allocation2 + $0x240] sm:$0xff]  ;;  %v1221_v33 = vld [vmem:[#allocation2 + $0x258] sm:$0xff] }
 0x3f2   :  { %v1220_v34 = vld [vmem:[#allocation2 + $0x250] sm:$0xff]  ;;  %v1223_v35 = vld [vmem:[#allocation2 + $0x268] sm:$0xff]  ;;  %v1222_v36 = vld [vmem:[#allocation2 + $0x260] sm:$0xff] }
 0x3f3   :  { %v1225_v37 = vld [vmem:[#allocation2 + $0x278] sm:$0xff]  ;;  %v1224_v38 = vld [vmem:[#allocation2 + $0x270] sm:$0xff]  ;;  %v1227_v39 = vld [vmem:[#allocation2 + $0x288] sm:$0xff] }
 0x3f4   :  { %1245 = vmatpush1.bf16.msra.mxu1 %v1212_v26  ;;  %v1226_v40 = vld [vmem:[#allocation2 + $0x280] sm:$0xff]  ;;  %v1229_v41 = vld [vmem:[#allocation2 + $0x298] sm:$0xff]  ;;  %v1228_v42 = vld [vmem:[#allocation2 + $0x290] sm:$0xff] }
 0x3f5   :  { %1246 = vmatprep.subr.bf16.mxu1 %v1215_v27  ;;  %v1231_v43 = vld [vmem:[#allocation2 + $0x2a8] sm:$0xff]  ;;  %v1230_v44 = vld [vmem:[#allocation2 + $0x2a0] sm:$0xff]  ;;  %v1233_v45 = vld [vmem:[#allocation2 + $0x2b8] sm:$0xff] }
 0x3f6   :  { %v1232_v46 = vld [vmem:[#allocation2 + $0x2b0] sm:$0xff]  ;;  %v1235_v47 = vld [vmem:[#allocation2 + $0x2c8] sm:$0xff]  ;;  %v1234_v48 = vld [vmem:[#allocation2 + $0x2c0] sm:$0xff] }
 0x3f7   :  { %v1237_v49 = vld [vmem:[#allocation2 + $0x2d8] sm:$0xff]  ;;  %v1236_v51 = vld [vmem:[#allocation2 + $0x2d0] sm:$0xff]  ;;  %v1239_v52 = vld [vmem:[#allocation2 + $0x2e8] sm:$0xff] }
 0x3f8   :  { %1247 = vmatpush1.bf16.msra.mxu1 %v1214_v28  ;;  %v1238_v53 = vld [vmem:[#allocation2 + $0x2e0] sm:$0xff]  ;;  %v1241_v54 = vld [vmem:[#allocation2 + $0x2f8] sm:$0xff]  ;;  %v1240_v55 = vld [vmem:[#allocation2 + $0x2f0] sm:$0xff] }
 0x3f9   :  { %1248 = vmatprep.subr.bf16.mxu1 %v1217_v29  ;;  %v1206_v57 = vld [vmem:[#allocation9 + $0x48] sm:$0xff]  ;;  %v1207_v58 = vld [vmem:[#allocation9 + $0x50] sm:$0xff] }
 0x3fc   :  { %1249 = vmatpush1.bf16.msra.mxu1 %v1216_v30 }
 0x3fd   :  { %1250 = vmatprep.subr.bf16.mxu1 %v1219_v31 }
 0x400   :  { %1251 = vmatpush1.bf16.msra.mxu1 %v1218_v32 }
 0x401   :  { %1252 = vmatprep.subr.bf16.mxu1 %v1221_v33 }
 0x404   :  { %1253 = vmatpush1.bf16.msra.mxu1 %v1220_v34 }
 0x405   :  { %1254 = vmatprep.subr.bf16.mxu1 %v1223_v35 }
 0x408   :  { %1255 = vmatpush1.bf16.msra.mxu1 %v1222_v36 }
 0x409   :  { %1256 = vmatprep.subr.bf16.mxu1 %v1225_v37 }
 0x40c   :  { %1257 = vmatpush1.bf16.msra.mxu1 %v1224_v38 }
 0x40d   :  { %1258 = vmatprep.subr.bf16.mxu1 %v1227_v39 }
 0x410   :  { %1259 = vmatpush1.bf16.msra.mxu1 %v1226_v40 }
 0x411   :  { %1260 = vmatprep.subr.bf16.mxu1 %v1229_v41 }
 0x414   :  { %1261 = vmatpush1.bf16.msra.mxu1 %v1228_v42 }
 0x415   :  { %1262 = vmatprep.subr.bf16.mxu1 %v1231_v43 }
 0x418   :  { %1263 = vmatpush1.bf16.msra.mxu1 %v1230_v44 }
 0x419   :  { %1264 = vmatprep.subr.bf16.mxu1 %v1233_v45 }
 0x41c   :  { %1265 = vmatpush1.bf16.msra.mxu1 %v1232_v46 }
 0x41d   :  { %1266 = vmatprep.subr.bf16.mxu1 %v1235_v47 }
 0x420   :  { %1267 = vmatpush1.bf16.msra.mxu1 %v1234_v48 }
 0x421   :  { %1268 = vmatprep.subr.bf16.mxu1 %v1237_v49 }
 0x424   :  { %1269 = vmatpush1.bf16.msra.mxu1 %v1236_v51 }
 0x425   :  { %1270 = vmatprep.subr.bf16.mxu1 %v1239_v52 }
 0x428   :  { %1271 = vmatpush1.bf16.msra.mxu1 %v1238_v53 }
 0x429   :  { %1272 = vmatprep.subr.bf16.mxu1 %v1241_v54 }
 0x42c   :  { %1273 = vmatpush1.bf16.msra.mxu1 %v1240_v55 }
 0x42f   :  { %1275 = vmatmul.mubr.bf16.vlgmr.msra.gmra.mrb[12].mxu1 %v1208_v56 }
 0x502   :  { %v1276_v59 = vpop.f32.mrb[12].mxu1 }
 0x503   :  { %v2216_v60 = vadd.f32 %v1276_v59, %v1206_v57  ;;  %v1278_v61 = vpop.f32.mrb[13].mxu1 }
 0x504   :  { %v1279_v62 = vadd.f32 %v1278_v61, %v1207_v58  ;;  %v1280_v63 = vpop.f32.mrb[14].mxu1 }
 0x505   :  { %v1283_v0 = vmax.f32 %v2216_v60, 0.0  ;;  %v1281_v1 = vpop.f32.mrb[15].mxu1 }
 0x506   :  { %v1284_v2 = vmax.f32 %v1279_v62, 0.0 }
 0x507   :  { %2033 = dma.done.wait [#allocation4 + $0x3], 4096 }
 0x508   :  { %2034 = vsyncadd [#allocation4 + $0x3], 4294963200  ;;  %v1291_v3 = vpack.c.bf16 %v1284_v2, %v1284_v2  ;;  %v2219_v4 = vld [vmem:[#allocation9 + $0x78] sm:$0xff]  ;;  %v2221_v5 = vld [vmem:[#allocation9 + $0x80] sm:$0xff]  ;;  %v1290_v39 = vpack.c.bf16 %v1283_v0, %v1283_v0  ;;  %v1377_v40 = vmul.f32 %v2196_v50, %v2196_v50 }
 0x509   :  { %v2223_v6 = vld [vmem:[#allocation9 + $0x88] sm:$0xff]  ;;  %v1293_v7 = vld [vmem:[#allocation2 + $0x308] sm:$0xff]  ;;  %v1292_v8 = vld [vmem:[#allocation2 + $0x300] sm:$0xff] }
 0x50a   :  { %1356 = vmatprep.mubr.bf16.mxu0 %v1291_v3  ;;  %v1295_v9 = vld [vmem:[#allocation2 + $0x318] sm:$0xff]  ;;  %1324 = vmatprep.subr.bf16.mxu0 %v1293_v7  ;;  %v1294_v10 = vld [vmem:[#allocation2 + $0x310] sm:$0xff]  ;;  %v1297_v11 = vld [vmem:[#allocation2 + $0x328] sm:$0xff] }
 0x50b   :  { %1325 = vmatpush1.bf16.msra.mxu0 %v1292_v8  ;;  %v1296_v12 = vld [vmem:[#allocation2 + $0x320] sm:$0xff]  ;;  %v1299_v13 = vld [vmem:[#allocation2 + $0x338] sm:$0xff]  ;;  %v1298_v14 = vld [vmem:[#allocation2 + $0x330] sm:$0xff]  ;;  %1378 = vadd.xlane.f32.xlu1 %v1377_v40 }
 0x50c   :  { %1326 = vmatprep.subr.bf16.mxu0 %v1295_v9  ;;  %v1301_v15 = vld [vmem:[#allocation2 + $0x348] sm:$0xff]  ;;  %v1300_v16 = vld [vmem:[#allocation2 + $0x340] sm:$0xff]  ;;  %v1303_v17 = vld [vmem:[#allocation2 + $0x358] sm:$0xff] }
 0x50d   :  { %v1302_v18 = vld [vmem:[#allocation2 + $0x350] sm:$0xff]  ;;  %v1305_v19 = vld [vmem:[#allocation2 + $0x368] sm:$0xff]  ;;  %v1304_v20 = vld [vmem:[#allocation2 + $0x360] sm:$0xff] }
 0x50e   :  { %v1307_v21 = vld [vmem:[#allocation2 + $0x378] sm:$0xff]  ;;  %v1306_v22 = vld [vmem:[#allocation2 + $0x370] sm:$0xff]  ;;  %v1309_v23 = vld [vmem:[#allocation2 + $0x388] sm:$0xff] }
 0x50f   :  { %1327 = vmatpush1.bf16.msra.mxu0 %v1294_v10  ;;  %v1308_v24 = vld [vmem:[#allocation2 + $0x380] sm:$0xff]  ;;  %v1311_v25 = vld [vmem:[#allocation2 + $0x398] sm:$0xff]  ;;  %v1310_v26 = vld [vmem:[#allocation2 + $0x390] sm:$0xff] }
 0x510   :  { %1328 = vmatprep.subr.bf16.mxu0 %v1297_v11  ;;  %v1313_v27 = vld [vmem:[#allocation2 + $0x3a8] sm:$0xff]  ;;  %v1312_v28 = vld [vmem:[#allocation2 + $0x3a0] sm:$0xff]  ;;  %v1315_v29 = vld [vmem:[#allocation2 + $0x3b8] sm:$0xff] }
 0x511   :  { %v1314_v30 = vld [vmem:[#allocation2 + $0x3b0] sm:$0xff]  ;;  %v1317_v31 = vld [vmem:[#allocation2 + $0x3c8] sm:$0xff]  ;;  %v1316_v32 = vld [vmem:[#allocation2 + $0x3c0] sm:$0xff] }
 0x512   :  { %v1319_v33 = vld [vmem:[#allocation2 + $0x3d8] sm:$0xff]  ;;  %v1318_v34 = vld [vmem:[#allocation2 + $0x3d0] sm:$0xff]  ;;  %v1321_v35 = vld [vmem:[#allocation2 + $0x3e8] sm:$0xff] }
 0x513   :  { %1329 = vmatpush1.bf16.msra.mxu0 %v1296_v12  ;;  %v1320_v36 = vld [vmem:[#allocation2 + $0x3e0] sm:$0xff]  ;;  %v1323_v37 = vld [vmem:[#allocation2 + $0x3f8] sm:$0xff]  ;;  %v1322_v38 = vld [vmem:[#allocation2 + $0x3f0] sm:$0xff] }
 0x514   :  { %1330 = vmatprep.subr.bf16.mxu0 %v1299_v13  ;;  %v1288_v41 = vld [vmem:[#allocation9 + $0x60] sm:$0xff]  ;;  %v1289_v43 = vld [vmem:[#allocation9 + $0x68] sm:$0xff] }
 0x517   :  { %1331 = vmatpush1.bf16.msra.mxu0 %v1298_v14 }
 0x518   :  { %1332 = vmatprep.subr.bf16.mxu0 %v1301_v15 }
 0x51b   :  { %1333 = vmatpush1.bf16.msra.mxu0 %v1300_v16 }
 0x51c   :  { %1334 = vmatprep.subr.bf16.mxu0 %v1303_v17 }
 0x51f   :  { %1335 = vmatpush1.bf16.msra.mxu0 %v1302_v18 }
 0x520   :  { %1336 = vmatprep.subr.bf16.mxu0 %v1305_v19 }
 0x523   :  { %1337 = vmatpush1.bf16.msra.mxu0 %v1304_v20 }
 0x524   :  { %1338 = vmatprep.subr.bf16.mxu0 %v1307_v21 }
 0x527   :  { %1339 = vmatpush1.bf16.msra.mxu0 %v1306_v22 }
 0x528   :  { %1340 = vmatprep.subr.bf16.mxu0 %v1309_v23 }
 0x52b   :  { %1341 = vmatpush1.bf16.msra.mxu0 %v1308_v24 }
 0x52c   :  { %1342 = vmatprep.subr.bf16.mxu0 %v1311_v25 }
 0x52f   :  { %1343 = vmatpush1.bf16.msra.mxu0 %v1310_v26 }
 0x530   :  { %1344 = vmatprep.subr.bf16.mxu0 %v1313_v27 }
 0x533   :  { %1345 = vmatpush1.bf16.msra.mxu0 %v1312_v28 }
 0x534   :  { %1346 = vmatprep.subr.bf16.mxu0 %v1315_v29 }
 0x537   :  { %1347 = vmatpush1.bf16.msra.mxu0 %v1314_v30 }
 0x538   :  { %1348 = vmatprep.subr.bf16.mxu0 %v1317_v31 }
 0x53b   :  { %1349 = vmatpush1.bf16.msra.mxu0 %v1316_v32 }
 0x53c   :  { %1350 = vmatprep.subr.bf16.mxu0 %v1319_v33 }
 0x53f   :  { %1351 = vmatpush1.bf16.msra.mxu0 %v1318_v34 }
 0x540   :  { %1352 = vmatprep.subr.bf16.mxu0 %v1321_v35 }
 0x543   :  { %1353 = vmatpush1.bf16.msra.mxu0 %v1320_v36 }
 0x544   :  { %1354 = vmatprep.subr.bf16.mxu0 %v1323_v37 }
 0x547   :  { %1355 = vmatpush1.bf16.msra.mxu0 %v1322_v38 }
 0x54a   :  { %1357 = vmatmul.mubr.bf16.vlgmr.msra.gmra.mrb[8].mxu0 %v1290_v39 }
 0x598   :  { %v1379_v52 = vpop.xlane.xlu1 %1378 }
 0x599   :  { %v1380_v53 = vmax.f32 %v1379_v52, 1e-24 }
 0x59b   :  { %1925 = vrsqrt.f32 %v1380_v53 }
 0x5a5   :  { %v1926_v54 = vpop.eup %1925 }
 0x5a6   :  { %v2231_v55 = vmul.f32 %v1926_v54, %v2196_v50 }
 0x61d   :  { %v1358_v42 = vpop.f32.mrb[8].mxu0 }
 0x61e   :  { %v1359_v44 = vadd.f32 %v1358_v42, %v1288_v41  ;;  %v1360_v45 = vpop.f32.mrb[9].mxu0 }
 0x61f   :  { %v1362_v46 = vpop.f32.mrb[10].mxu0  ;;  %v1361_v47 = vadd.f32 %v1360_v45, %v1289_v43 }
 0x620   :  { %v1363_v48 = vpop.f32.mrb[11].mxu0  ;;  %v1365_v49 = vmul.f32 %v1359_v44, %v1359_v44 }
 0x621   :  { %v1371_v51 = vmul.f32 %v1361_v47, %v1361_v47 }
 0x622   :  { %1366 = vadd.xlane.f32.xlu0 %v1365_v49 }
 0x626   :  { %1372 = vadd.xlane.f32.xlu0 %v1371_v51 }
 0x6af   :  { %v1367_v56 = vpop.xlane.xlu0 %1366 }
 0x6b0   :  { %v1368_v57 = vmax.f32 %v1367_v56, 1e-24 }
 0x6b2   :  { %1927 = vrsqrt.f32 %v1368_v57 }
 0x6b3   :  { %v1373_v58 = vpop.xlane.xlu0 %1372 }
 0x6b4   :  { %v1374_v59 = vmax.f32 %v1373_v58, 1e-24 }
 0x6b6   :  { %1929 = vrsqrt.f32 %v1374_v59 }
 0x6bc   :  { %v1928_v60 = vpop.eup %1927 }
 0x6bd   :  { %v1370_v61 = vmul.f32 %v1928_v60, %v1359_v44 }
 0x6c0   :  { %v1930_v62 = vpop.eup %1929 }
 0x6c1   :  { %v1376_v63 = vmul.f32 %v1930_v62, %v1361_v47 }
 0x6c2   :  { %2035 = dma.done.wait [#allocation4 + $0x4], 3072 }
 0x6c3   :  { %2036 = vsyncadd [#allocation4 + $0x4], 4294964224  ;;  %v1392_v0 = vpack.c.bf16 %v1376_v63, %v1376_v63  ;;  %v1402_v1 = vld [vmem:[#allocation3 + $0x40] sm:$0xff]  ;;  %v1403_v3 = vld [vmem:[#allocation3 + $0x48] sm:$0xff]  ;;  %v1391_v19 = vpack.c.bf16 %v1370_v61, %v1370_v61  ;;  %v2062_v20 = vmov 0.0   ;;  %vm2063_vm0 = vmmov 0  }
 0x6c4   :  { %v1394_v2 = vld [vmem:[#allocation3] sm:$0xff]  ;;  %1709 = vmatprep.subr.bf16.mxu1 %v1402_v1  ;;  %v1395_v50 = vld [vmem:[#allocation3 + $0x8] sm:$0xff]  ;;  %v1404_v7 = vld [vmem:[#allocation3 + $0x50] sm:$0xff]  ;;  %v1393_v29 = vpack.c.bf16 %v2231_v55, %v2231_v55  ;;  %vm1509_vm1 = vcmask 7168  }
 0x6c5   :  { %1450 = vmatprep.mubr.bf16.mxu1 %v1392_v0  ;;  %1710 = vmatpush3.bf16.msra.mxu1 %v1394_v2  ;;  %v1396_v8 = vld [vmem:[#allocation3 + $0x10] sm:$0xff]  ;;  %v1405_v9 = vld [vmem:[#allocation3 + $0x58] sm:$0xff]  ;;  %v1406_v11 = vld [vmem:[#allocation3 + $0x60] sm:$0xff] }
 0x6c6   :  { %1711 = vmatprep.subr.bf16.mxu1 %v1403_v3  ;;  %v1397_v10 = vld [vmem:[#allocation3 + $0x18] sm:$0xff]  ;;  %v1398_v12 = vld [vmem:[#allocation3 + $0x20] sm:$0xff]  ;;  %v1407_v13 = vld [vmem:[#allocation3 + $0x68] sm:$0xff] }
 0x6c7   :  { %v1399_v14 = vld [vmem:[#allocation3 + $0x28] sm:$0xff]  ;;  %v1408_v15 = vld [vmem:[#allocation3 + $0x70] sm:$0xff]  ;;  %v1409_v17 = vld [vmem:[#allocation3 + $0x78] sm:$0xff] }
 0x6c8   :  { %v1400_v16 = vld [vmem:[#allocation3 + $0x30] sm:$0xff]  ;;  %v1401_v18 = vld [vmem:[#allocation3 + $0x38] sm:$0xff]  ;;  %v1410_v21 = vld [vmem:[#allocation3 + $0x80] sm:$0xff] }
 0x6c9   :  { %1712 = vmatpush3.bf16.msra.mxu1 %v1395_v50  ;;  %v1411_v22 = vld [vmem:[#allocation3 + $0x88] sm:$0xff]  ;;  %v1412_v23 = vld [vmem:[#allocation3 + $0x90] sm:$0xff]  ;;  %v1413_v24 = vld [vmem:[#allocation3 + $0x98] sm:$0xff] }
 0x6ca   :  { %1713 = vmatprep.subr.bf16.mxu1 %v1404_v7  ;;  %v1414_v25 = vld [vmem:[#allocation3 + $0xa0] sm:$0xff]  ;;  %v1415_v26 = vld [vmem:[#allocation3 + $0xa8] sm:$0xff]  ;;  %v1416_v27 = vld [vmem:[#allocation3 + $0xb0] sm:$0xff] }
 0x6cb   :  { %v1417_v28 = vld [vmem:[#allocation3 + $0xb8] sm:$0xff] }
 0x6cd   :  { %1714 = vmatpush3.bf16.msra.mxu1 %v1396_v8 }
 0x6ce   :  { %1715 = vmatprep.subr.bf16.mxu1 %v1405_v9 }
 0x6d1   :  { %1716 = vmatpush3.bf16.msra.mxu1 %v1397_v10 }
 0x6d2   :  { %1717 = vmatprep.subr.bf16.mxu1 %v1406_v11 }
 0x6d5   :  { %1718 = vmatpush3.bf16.msra.mxu1 %v1398_v12 }
 0x6d6   :  { %1719 = vmatprep.subr.bf16.mxu1 %v1407_v13 }
 0x6d9   :  { %1720 = vmatpush3.bf16.msra.mxu1 %v1399_v14 }
 0x6da   :  { %1721 = vmatprep.subr.bf16.mxu1 %v1408_v15 }
 0x6dd   :  { %1722 = vmatpush3.bf16.msra.mxu1 %v1400_v16 }
 0x6de   :  { %1723 = vmatprep.subr.bf16.mxu1 %v1409_v17 }
 0x6e1   :  { %1724 = vmatpush3.bf16.msra.mxu1 %v1401_v18 }
 0x6e2   :  { %1740 = vmatprep.subr.bf16.mxu1 %v2062_v20 }
 0x6e4   :  { %1451 = vmatmul.mubr.bf16.vlgmr.msra.gmra.mrb[16].mxu1 %v1391_v19 }
 0x6e5   :  { %1741 = vmatpush3.bf16.msra.mxu1 %v1410_v21  ;;  %1756 = vmatprep.mubr.msk.bf16.mxu1 %vm2063_vm0, %v2062_v20 }
 0x6e6   :  { %1742 = vmatprep.subr.bf16.mxu1 %v2062_v20 }
 0x6e9   :  { %1743 = vmatpush3.bf16.msra.mxu1 %v1411_v22 }
 0x6ea   :  { %1744 = vmatprep.subr.bf16.mxu1 %v2062_v20 }
 0x6ed   :  { %1745 = vmatpush3.bf16.msra.mxu1 %v1412_v23 }
 0x6ee   :  { %1746 = vmatprep.subr.bf16.mxu1 %v2062_v20 }
 0x6f1   :  { %1747 = vmatpush3.bf16.msra.mxu1 %v1413_v24 }
 0x6f2   :  { %1748 = vmatprep.subr.bf16.mxu1 %v2062_v20 }
 0x6f5   :  { %1749 = vmatpush3.bf16.msra.mxu1 %v1414_v25 }
 0x6f6   :  { %1750 = vmatprep.subr.bf16.mxu1 %v2062_v20 }
 0x6f9   :  { %1751 = vmatpush3.bf16.msra.mxu1 %v1415_v26 }
 0x6fa   :  { %1752 = vmatprep.subr.bf16.mxu1 %v2062_v20 }
 0x6fd   :  { %1753 = vmatpush3.bf16.msra.mxu1 %v1416_v27 }
 0x6fe   :  { %1754 = vmatprep.subr.bf16.mxu1 %v2062_v20 }
 0x701   :  { %1755 = vmatpush3.bf16.msra.mxu1 %v1417_v28 }
 0x704   :  { %1757 = vmatmul.mubr.bf16.vlgmr.msra.gmra.mrb[20].mxu1 %v1393_v29 }
 0x7b7   :  { %v1725_v30 = vpop.f32.mrb[16].mxu1 }
 0x7b8   :  { %v1726_v31 = vpop.f32.mrb[17].mxu1 }
 0x7b9   :  { %v1727_v32 = vadd.f32 %v1726_v31, %v1725_v30  ;;  %v1728_v33 = vpop.f32.mrb[18].mxu1 }
 0x7ba   :  { %v1729_v34 = vpop.f32.mrb[19].mxu1 }
 0x7bb   :  { %v1453_v35 = vadd.f32 %v1727_v32, %v2219_v4 }
 0x7d7   :  { %v1492_v36 = vpop.f32.mrb[20].mxu1 }
 0x7d8   :  { %v1493_v37 = vadd.f32 %v1492_v36, %v1453_v35  ;;  %v1758_v38 = vpop.f32.mrb[21].mxu1 }
 0x7d9   :  { %v1495_v39 = vpop.f32.mrb[22].mxu1 }
 0x7da   :  { %v1759_v40 = vpop.f32.mrb[23].mxu1  ;;  %v1498_v41 = vmax.f32 %v1493_v37, 0.0 }
 0x7dc   :  { %v1499_v42 = vmul.f32 %v1498_v41, %v2221_v5 }
 0x7de   :  { %v1500_v43 = vadd.f32 %v1499_v42, %v2223_v6 }
 0x7e0   :  { %1501 = vadd.xlane.f32.xlu0 %v1500_v43 }
 0x86d   :  { %v1502_v44 = vpop.xlane.xlu0 %1501 }
 0x86e   :  { %v1659_v45 = vmul.f32 -1.442695, %v1502_v44 }
 0x870   :  { %1931 = vpow2.f32 %v1659_v45 }
 0x87a   :  { %v1932_v46 = vpop.eup %1931 }
 0x87b   :  { %v1506_v47 = vadd.f32 1.0, %v1932_v46 }
 0x87d   :  { %1933 = vrcp.f32 %v1506_v47 }
 0x887   :  { %v1934_v48 = vpop.eup %1933 }
 0x888   :  { %1510 = vst.msk [vmem:[%s2246_s5] sm:$0xff] %vm1509_vm1, %v1934_v48 }
 0x889   :  { %1515 = vsyncpa [#allocation6], 1 }
 0x88a   :  { %1516 = vsyncpa [#allocation8], 1 }
 0x88b   :  { %1517 = vsyncmov [#allocation4] }
 0x88e   :  { %s1518_s23 = vpop.sfrf %1517 }
 0x88f   :  { %p1660_p4 = scmp.ne.s32.totalorder %s1518_s23, 0 }
 0x891   :  { %1522 = shalt.err (%p1660_p4)  }
 0x892   :  { %1524 = vsyncmov [#allocation4 + $0x1] }
 0x895   :  { %s1525_s24 = vpop.sfrf %1524 }
 0x896   :  { %p1661_p5 = scmp.ne.s32.totalorder %s1525_s24, 0 }
 0x898   :  { %1529 = shalt.err (%p1661_p5)  }
 0x899   :  { %1531 = vsyncmov [#allocation4 + $0x2] }
 0x89c   :  { %s1532_s25 = vpop.sfrf %1531 }
 0x89d   :  { %p1662_p6 = scmp.ne.s32.totalorder %s1532_s25, 0 }
 0x89f   :  { %1536 = shalt.err (%p1662_p6)  }
 0x8a0   :  { %1538 = vsyncmov [#allocation4 + $0x3] }
 0x8a3   :  { %s1539_s26 = vpop.sfrf %1538 }
 0x8a4   :  { %p1663_p7 = scmp.ne.s32.totalorder %s1539_s26, 0 }
 0x8a6   :  { %1543 = shalt.err (%p1663_p7)  }
 0x8a7   :  { %1545 = vsyncmov [#allocation4 + $0x4] }
 0x8aa   :  { %s1546_s5 = vpop.sfrf %1545 }
 0x8ab   :  { %p1664_p8 = scmp.ne.s32.totalorder %s1546_s5, 0 }
 0x8ad   :  { %1550 = shalt.err (%p1664_p8)  }

</bundles_post_ra>
